<compile_context>
chip_gen: v7x
topology: tpu7x:2x2x1
jax: 0.10.0
libtpu: 0.0.40
codegen_flags: <defaults>
</compile_context>

<pallas_src>
import functools

import jax
import jax.numpy as jnp
from jax.experimental import pallas as pl
from jax.experimental.pallas import tpu as pltpu

LOG_SIG_MAX = 2.0
LOG_SIG_MIN = -20.0


def _round_up(n, m):
    return ((n + m - 1) // m) * m


def _policy_mlp_kernel(x_ref,
                       w1_ref, b1_ref,
                       w2_ref, b2_ref,
                       wh_ref, bh_ref,
                       out_ref, *, out_dim):
    """Fused forward for one batch tile. Outputs [tile, 2*out_dim (padded)]:
    columns [0, out_dim) = mean, [out_dim, 2*out_dim) = clamped log_std."""
    compute_dtype = w1_ref.dtype          # f32 or bf16 (MXU input dtype)

    x = x_ref[...].astype(compute_dtype)

    # fc_1 + ReLU  (f32 accumulation, bias/ReLU in f32)
    h1 = jnp.dot(x, w1_ref[...], preferred_element_type=jnp.float32) + b1_ref[...]
    h1 = jnp.maximum(h1, 0.0)

    # fc_2 + ReLU
    h2 = jnp.dot(h1.astype(compute_dtype), w2_ref[...],
                 preferred_element_type=jnp.float32) + b2_ref[...]
    h2 = jnp.maximum(h2, 0.0)

    # fused heads: [mean | log_std] in one lane-dense matmul + store
    head = jnp.dot(h2.astype(compute_dtype), wh_ref[...],
                   preferred_element_type=jnp.float32) + bh_ref[...]

    # clamp only the log_std columns [out_dim, 2*out_dim)
    col = jax.lax.broadcasted_iota(jnp.int32, head.shape, 1)
    is_std = (col >= out_dim) & (col < 2 * out_dim)
    head = jnp.where(is_std, jnp.clip(head, LOG_SIG_MIN, LOG_SIG_MAX), head)

    out_ref[...] = head.astype(out_ref.dtype)


def pack_policy_params(params, compute_dtype=jnp.float32):
    """Pad feature dims to multiples of 128 and fuse the two heads.

    params: dict with w1 [in,h1], b1 [*,h1], w2 [h1,h2], b2 [*,h2],
            wm [h2,out], bm [*,out], ws [h2,out], bs [*,out]
    Returns (packed_params, meta). Weights are cast to compute_dtype
    (bf16 recommended on v6e/v7x); biases stay f32.
    """
    w1, b1 = params["w1"], params["b1"]
    w2, b2 = params["w2"], params["b2"]
    wm, bm = params["wm"], params["bm"]
    ws, bs = params["ws"], params["bs"]

    in_dim, h1 = w1.shape
    h2 = w2.shape[1]
    out_dim = wm.shape[1]

    in_p = _round_up(in_dim, 128)
    h1_p = _round_up(h1, 128)
    h2_p = _round_up(h2, 128)
    head_p = _round_up(2 * out_dim, 128)

    def pad2(a, rows, cols):
        return jnp.pad(a, ((0, rows - a.shape[0]), (0, cols - a.shape[1])))

    wh = jnp.concatenate([wm, ws], axis=1)                       # [h2, 2*out]
    bh = jnp.concatenate([bm.reshape(1, -1), bs.reshape(1, -1)], axis=1)

    packed = {
        "w1": pad2(w1, in_p, h1_p).astype(compute_dtype),
        "b1": pad2(b1.reshape(1, -1), 1, h1_p).astype(jnp.float32),
        "w2": pad2(w2, h1_p, h2_p).astype(compute_dtype),
        "b2": pad2(b2.reshape(1, -1), 1, h2_p).astype(jnp.float32),
        "wh": pad2(wh, h2_p, head_p).astype(compute_dtype),
        "bh": pad2(bh, 1, head_p).astype(jnp.float32),
    }
    meta = dict(input_dim=in_dim, out_dim=out_dim,
                in_p=in_p, h1_p=h1_p, h2_p=h2_p, head_p=head_p)
    return packed, meta


def policy_mlp_forward(x, packed, meta, *, batch_tile=None,
                       vmem_limit_bytes=32 * 1024 * 1024):
    """Run the fused PolicyMLP forward pass.

    x: [B, input_dim] float32
    Returns (mean [B, out_dim], clamped log_std [B, out_dim]) matching the
    PyTorch module's forward().
    """
    B, in_dim = x.shape
    assert in_dim == meta["input_dim"]
    out_dim = meta["out_dim"]
    in_p, h1_p, h2_p, head_p = (meta["in_p"], meta["h1_p"],
                                meta["h2_p"], meta["head_p"])

    # --- batch tiling: sublane-aligned tile, pad batch to a multiple of it ---
    SUBLANE = 8
    if batch_tile is None:
        batch_tile = 256
    batch_tile = min(batch_tile, _round_up(B, SUBLANE))
    batch_tile = max(SUBLANE, (batch_tile // SUBLANE) * SUBLANE)
    B_pad = _round_up(B, batch_tile)

    x_p = x
    if B_pad != B or in_p != in_dim:
        x_p = jnp.pad(x, ((0, B_pad - B), (0, in_p - in_dim)))

    grid = (B_pad // batch_tile,)

    def const_spec(arr):
        # whole-array block, index never changes -> single-buffered in VMEM
        return pl.BlockSpec(arr.shape, lambda i: (0, 0),
                            pipeline_mode=pl.Buffered(buffer_count=1))

    in_specs = [
        pl.BlockSpec((batch_tile, in_p), lambda i: (i, 0)),
        const_spec(packed["w1"]), const_spec(packed["b1"]),
        const_spec(packed["w2"]), const_spec(packed["b2"]),
        const_spec(packed["wh"]), const_spec(packed["bh"]),
    ]
    out_specs = pl.BlockSpec((batch_tile, head_p), lambda i: (i, 0))
    out_shape = jax.ShapeDtypeStruct((B_pad, head_p), x.dtype)

    flops = 2 * B_pad * (in_p * h1_p + h1_p * h2_p + h2_p * head_p)
    bytes_accessed = (
        x_p.size * x_p.dtype.itemsize
        + sum(int(v.size) * v.dtype.itemsize for v in packed.values())
        + B_pad * head_p * jnp.dtype(x.dtype).itemsize)

    head = pl.pallas_call(
        functools.partial(_policy_mlp_kernel, out_dim=out_dim),
        grid=grid,
        in_specs=in_specs,
        out_specs=out_specs,
        out_shape=out_shape,
        compiler_params=pltpu.CompilerParams(
            dimension_semantics=("parallel",),
            vmem_limit_bytes=vmem_limit_bytes),
        cost_estimate=pl.CostEstimate(flops=flops, transcendentals=0,
                                      bytes_accessed=bytes_accessed),
    )(x_p, packed["w1"], packed["b1"], packed["w2"], packed["b2"],
      packed["wh"], packed["bh"])

    mean = head[:B, :out_dim]
    log_std = head[:B, out_dim:2 * out_dim]
    return mean, log_std


def xavier_normal(key, fan_in, fan_out, dtype=jnp.float32):
    # matches torch.nn.init.xavier_normal_: std = sqrt(2 / (fan_in + fan_out))
    std = (2.0 / (fan_in + fan_out)) ** 0.5
    return std * jax.random.normal(key, (fan_in, fan_out), dtype=dtype)


def init_policy_mlp_params(key, input_dim, hidden_dim1, hidden_dim2, output_dim):
    k1, k2, k3, k4 = jax.random.split(key, 4)
    return {
        "w1": xavier_normal(k1, input_dim, hidden_dim1),
        "b1": jnp.zeros((1, hidden_dim1), jnp.float32),
        "w2": xavier_normal(k2, hidden_dim1, hidden_dim2),
        "b2": jnp.zeros((1, hidden_dim2), jnp.float32),
        "wm": xavier_normal(k3, hidden_dim2, output_dim),
        "bm": jnp.zeros((1, output_dim), jnp.float32),
        "ws": xavier_normal(k4, hidden_dim2, output_dim),
        "bs": jnp.zeros((1, output_dim), jnp.float32),
    }


def _reference_forward(x, p):
    h1 = jnp.maximum(x @ p["w1"] + p["b1"], 0.0)
    h2 = jnp.maximum(h1 @ p["w2"] + p["b2"], 0.0)
    mean = h2 @ p["wm"] + p["bm"]
    std = jnp.clip(h2 @ p["ws"] + p["bs"], LOG_SIG_MIN, LOG_SIG_MAX)
    return mean, std


# TODO(synk): select_action (Normal rsample / tanh squash / log_prob) is not part
# of forward() and is left to plain JAX outside the kernel.

if __name__ == "__main__":
    input_dim, hidden_dim1, hidden_dim2, output_dim = 16, 32, 32, 8

    key = jax.random.PRNGKey(0)
    k_params, k_x1, k_x2 = jax.random.split(key, 3)
    params = init_policy_mlp_params(k_params, input_dim, hidden_dim1,
                                    hidden_dim2, output_dim)

    # --- f32 path, batch large enough for a multi-step (pipelined) grid ---
    x = jax.random.normal(k_x1, (512, input_dim), dtype=jnp.float32)
    packed_f32, meta_f32 = pack_policy_params(params, compute_dtype=jnp.float32)
    mean, log_std = policy_mlp_forward(x, packed_f32, meta_f32)   # grid = (2,)
    jax.block_until_ready((mean, log_std))

    ref_mean, ref_std = _reference_forward(x, params)
    assert mean.shape == (512, output_dim) and log_std.shape == (512, output_dim)
    assert jnp.allclose(mean, ref_mean, atol=1e-5, rtol=1e-5)
    assert jnp.allclose(log_std, ref_std, atol=1e-5, rtol=1e-5)

    # --- small / ragged batch (exercises row + lane padding) ---
    x_small = jax.random.normal(k_x2, (5, input_dim), dtype=jnp.float32)
    m2, s2 = policy_mlp_forward(x_small, packed_f32, meta_f32)
    jax.block_until_ready((m2, s2))
    rm2, rs2 = _reference_forward(x_small, params)
    assert jnp.allclose(m2, rm2, atol=1e-5, rtol=1e-5)
    assert jnp.allclose(s2, rs2, atol=1e-5, rtol=1e-5)

    # --- bf16 MXU path (v6e/v7x): bf16 weights/activations, f32 accumulation ---
    packed_bf16, meta_bf16 = pack_policy_params(params, compute_dtype=jnp.bfloat16)
    m3, s3 = policy_mlp_forward(x, packed_bf16, meta_bf16)
    jax.block_until_ready((m3, s3))
    assert jnp.allclose(m3, ref_mean, atol=1e-1, rtol=5e-2)
    assert jnp.allclose(s3, ref_std, atol=1e-1, rtol=5e-2)

    print("KERNEL_OK")
</pallas_src>

<mosaic_0001>
module attributes {stable_mosaic.version = 11 : i64} {
  func.func @_policy_mlp_kernel(%arg0: i32, %arg1: memref<256x128xf32, #tpu.memory_space<vmem>>, %arg2: memref<128x128xf32, #tpu.memory_space<vmem>>, %arg3: memref<1x128xf32, #tpu.memory_space<vmem>>, %arg4: memref<128x128xf32, #tpu.memory_space<vmem>>, %arg5: memref<1x128xf32, #tpu.memory_space<vmem>>, %arg6: memref<128x128xf32, #tpu.memory_space<vmem>>, %arg7: memref<1x128xf32, #tpu.memory_space<vmem>>, %arg8: memref<256x128xf32, #tpu.memory_space<vmem>>) attributes {dimension_semantics = [#tpu.dimension_semantics<parallel>], iteration_bounds = array<i64: 2>, scalar_prefetch = 0 : i64, scratch_operands = 0 : i64, tpu.core_type = #tpu.core_type<tc>, window_params = [{transform_indices = @transform_0, window_bounds = array<i64: 256, 128>}, {pipeline_mode = #tpu.pipeline_mode<synchronous>, transform_indices = @transform_1, window_bounds = array<i64: 128, 128>}, {pipeline_mode = #tpu.pipeline_mode<synchronous>, transform_indices = @transform_2, window_bounds = array<i64: 1, 128>}, {pipeline_mode = #tpu.pipeline_mode<synchronous>, transform_indices = @transform_3, window_bounds = array<i64: 128, 128>}, {pipeline_mode = #tpu.pipeline_mode<synchronous>, transform_indices = @transform_4, window_bounds = array<i64: 1, 128>}, {pipeline_mode = #tpu.pipeline_mode<synchronous>, transform_indices = @transform_5, window_bounds = array<i64: 128, 128>}, {pipeline_mode = #tpu.pipeline_mode<synchronous>, transform_indices = @transform_6, window_bounds = array<i64: 1, 128>}, {transform_indices = @transform_7, window_bounds = array<i64: 256, 128>}]} {
    %c0 = arith.constant 0 : index
    %c0_0 = arith.constant 0 : index
    %0 = vector.load %arg1[%c0, %c0_0] : memref<256x128xf32, #tpu.memory_space<vmem>>, vector<256x128xf32>
    %c0_1 = arith.constant 0 : index
    %c0_2 = arith.constant 0 : index
    %1 = vector.load %arg2[%c0_1, %c0_2] : memref<128x128xf32, #tpu.memory_space<vmem>>, vector<128x128xf32>
    %cst = arith.constant dense<0.000000e+00> : vector<256x128xf32>
    %2 = tpu.matmul %0, %1, %cst {dimension_numbers = #tpu.dot_dimension_numbers<[1], [0], [0], [1], [0, 0, 1, 1], [], []>} : vector<256x128xf32>, vector<128x128xf32>, vector<256x128xf32> -> vector<256x128xf32>
    %c0_3 = arith.constant 0 : index
    %c0_4 = arith.constant 0 : index
    %3 = vector.load %arg3[%c0_3, %c0_4] : memref<1x128xf32, #tpu.memory_space<vmem>>, vector<1x128xf32>
    %4 = vector.broadcast %3 : vector<1x128xf32> to vector<256x128xf32>
    %5 = arith.addf %2, %4 : vector<256x128xf32>
    %cst_5 = arith.constant 0.000000e+00 : f32
    %6 = vector.broadcast %cst_5 : f32 to vector<256x128xf32>
    %7 = arith.maximumf %5, %6 : vector<256x128xf32>
    %c0_6 = arith.constant 0 : index
    %c0_7 = arith.constant 0 : index
    %8 = vector.load %arg4[%c0_6, %c0_7] : memref<128x128xf32, #tpu.memory_space<vmem>>, vector<128x128xf32>
    %cst_8 = arith.constant dense<0.000000e+00> : vector<256x128xf32>
    %9 = tpu.matmul %7, %8, %cst_8 {dimension_numbers = #tpu.dot_dimension_numbers<[1], [0], [0], [1], [0, 0, 1, 1], [], []>} : vector<256x128xf32>, vector<128x128xf32>, vector<256x128xf32> -> vector<256x128xf32>
    %c0_9 = arith.constant 0 : index
    %c0_10 = arith.constant 0 : index
    %10 = vector.load %arg5[%c0_9, %c0_10] : memref<1x128xf32, #tpu.memory_space<vmem>>, vector<1x128xf32>
    %11 = vector.broadcast %10 : vector<1x128xf32> to vector<256x128xf32>
    %12 = arith.addf %9, %11 : vector<256x128xf32>
    %cst_11 = arith.constant 0.000000e+00 : f32
    %13 = vector.broadcast %cst_11 : f32 to vector<256x128xf32>
    %14 = arith.maximumf %12, %13 : vector<256x128xf32>
    %c0_12 = arith.constant 0 : index
    %c0_13 = arith.constant 0 : index
    %15 = vector.load %arg6[%c0_12, %c0_13] : memref<128x128xf32, #tpu.memory_space<vmem>>, vector<128x128xf32>
    %cst_14 = arith.constant dense<0.000000e+00> : vector<256x128xf32>
    %16 = tpu.matmul %14, %15, %cst_14 {dimension_numbers = #tpu.dot_dimension_numbers<[1], [0], [0], [1], [0, 0, 1, 1], [], []>} : vector<256x128xf32>, vector<128x128xf32>, vector<256x128xf32> -> vector<256x128xf32>
    %c0_15 = arith.constant 0 : index
    %c0_16 = arith.constant 0 : index
    %17 = vector.load %arg7[%c0_15, %c0_16] : memref<1x128xf32, #tpu.memory_space<vmem>>, vector<1x128xf32>
    %18 = vector.broadcast %17 : vector<1x128xf32> to vector<256x128xf32>
    %19 = arith.addf %16, %18 : vector<256x128xf32>
    %20 = tpu.iota {dimensions = array<i32: 1>} : vector<256x128xi32>
    %c8_i32 = arith.constant 8 : i32
    %21 = vector.broadcast %c8_i32 : i32 to vector<256x128xi32>
    %22 = arith.cmpi sge, %20, %21 : vector<256x128xi32>
    %c16_i32 = arith.constant 16 : i32
    %23 = vector.broadcast %c16_i32 : i32 to vector<256x128xi32>
    %24 = arith.cmpi slt, %20, %23 : vector<256x128xi32>
    %25 = arith.andi %22, %24 : vector<256x128xi1>
    %cst_17 = arith.constant -2.000000e+01 : f32
    %cst_18 = arith.constant 2.000000e+00 : f32
    %26 = vector.broadcast %cst_17 : f32 to vector<256x128xf32>
    %27 = arith.maximumf %26, %19 : vector<256x128xf32>
    %28 = vector.broadcast %cst_18 : f32 to vector<256x128xf32>
    %29 = arith.minimumf %28, %27 : vector<256x128xf32>
    %30 = arith.select %25, %29, %19 : vector<256x128xi1>, vector<256x128xf32>
    %c0_19 = arith.constant 0 : index
    %c0_20 = arith.constant 0 : index
    %31 = vector.load %arg8[%c0_19, %c0_20] : memref<256x128xf32, #tpu.memory_space<vmem>>, vector<256x128xf32>
    tpu.vector_store %arg8[%c0_19, %c0_20], %30 {strides = array<i32>} : memref<256x128xf32, #tpu.memory_space<vmem>>, vector<256x128xf32>,
    return
  }
  func.func @transform_0(%arg0: i32) -> (i32, i32) {
    %c0_i32 = arith.constant 0 : i32
    %c0_i32_0 = arith.constant 0 : i32
    return %arg0, %c0_i32 : i32, i32
  }
  func.func @transform_1(%arg0: i32) -> (i32, i32) {
    %c0_i32 = arith.constant 0 : i32
    %c0_i32_0 = arith.constant 0 : i32
    %c0_i32_1 = arith.constant 0 : i32
    return %c0_i32, %c0_i32_0 : i32, i32
  }
  func.func @transform_2(%arg0: i32) -> (i32, i32) {
    %c0_i32 = arith.constant 0 : i32
    %c0_i32_0 = arith.constant 0 : i32
    %c0_i32_1 = arith.constant 0 : i32
    return %c0_i32, %c0_i32_0 : i32, i32
  }
  func.func @transform_3(%arg0: i32) -> (i32, i32) {
    %c0_i32 = arith.constant 0 : i32
    %c0_i32_0 = arith.constant 0 : i32
    %c0_i32_1 = arith.constant 0 : i32
    return %c0_i32, %c0_i32_0 : i32, i32
  }
  func.func @transform_4(%arg0: i32) -> (i32, i32) {
    %c0_i32 = arith.constant 0 : i32
    %c0_i32_0 = arith.constant 0 : i32
    %c0_i32_1 = arith.constant 0 : i32
    return %c0_i32, %c0_i32_0 : i32, i32
  }
  func.func @transform_5(%arg0: i32) -> (i32, i32) {
    %c0_i32 = arith.constant 0 : i32
    %c0_i32_0 = arith.constant 0 : i32
    %c0_i32_1 = arith.constant 0 : i32
    return %c0_i32, %c0_i32_0 : i32, i32
  }
  func.func @transform_6(%arg0: i32) -> (i32, i32) {
    %c0_i32 = arith.constant 0 : i32
    %c0_i32_0 = arith.constant 0 : i32
    %c0_i32_1 = arith.constant 0 : i32
    return %c0_i32, %c0_i32_0 : i32, i32
  }
  func.func @transform_7(%arg0: i32) -> (i32, i32) {
    %c0_i32 = arith.constant 0 : i32
    %c0_i32_0 = arith.constant 0 : i32
    return %arg0, %c0_i32 : i32, i32
  }
}

</mosaic_0001>

<bundles_post_ra>
// kernel: tpu_custom_call.1
= control target key start
LH: loop header
LB: loop body
LE: loop exit
PB: predicated region body
PF: predicated region fallthrough
CT: control target
= control target key end

     0   :  { %12 = vsyncpa [#allocation3], 0  ;;  %s2823_s0 = inlined_call_operand.hbm [shape: f32[512,128], index: 0, kind: input, shape index: {}]   ;;  %s2824_s1 = inlined_call_operand.hbm [shape: f32[128,128], index: 1, kind: input, shape index: {}]   ;;  %s2825_s2 = inlined_call_operand.vmem [shape: f32[1,128], index: 2, kind: input, shape index: {}]   ;;  %s2826_s3 = inlined_call_operand.hbm [shape: f32[128,128], index: 3, kind: input, shape index: {}]   ;;  %s2827_s4 = inlined_call_operand.vmem [shape: f32[1,128], index: 4, kind: input, shape index: {}]   ;;  %s2828_s5 = inlined_call_operand.hbm [shape: f32[128,128], index: 5, kind: input, shape index: {}]   ;;  %s2829_s6 = inlined_call_operand.vmem [shape: f32[1,128], index: 6, kind: input, shape index: {}]   ;;  %s2830_s7 = inlined_call_operand.hbm [shape: f32[512,128], index: 7, kind: output, shape index: {}]  }
   0x1   :  { %14 = vsyncpa [#allocation3 + $0x1], 0 }
   0x2   :  { %15 = vsyncpa [#allocation6], 0 }
   0x3   :  { %16 = vsyncpa [#allocation9], 0 }
   0x4   :  { %17 = vsyncpa [#allocation4], 0 }
   0x5   :  { %19 = vsyncpa [#allocation4 + $0x1], 0  ;;  %s2273_s24 = smov 0   ;;  %s2275_s25 = smov 0  }
   0x6   :  { %s2277_s26 = smov 0   ;;  %s2279_s27 = smov 0  }
   0x7 LB: > { %s2294_s28 = sadd.s32 4294967295, %s2222_s27   ;;  %s1432_s29 = sadd.s32 4294967294, %s2222_s27   ;;  %s2222_s27 = sphi %s2279_s27, %s2858_s27   ;;  %s2218_s26 = sphi %s2277_s26, %s2857_s26   ;;  %s2214_s25 = sphi %s2275_s25, %s2856_s25   ;;  %s2210_s24 = sphi %s2273_s24, %s2855_s24  }
   0x8   : > { %p45_p0 = scmp.ne.s32.totalorder %s2214_s25, %s2210_s24  ;;  %p2831_p1 = scmp.eq.s32.totalorder %s2294_s28, 0 }
   0x9   : > { %p201_p3 = scmp.eq.s32.totalorder %s1432_s29, 1  ;;  %p1433_p5 = scmp.ge.s32.totalorder %s2222_s27, 1 }
   0xa   : > { %p2303_p4 = por %p2831_p1, %p45_p0  ;;  %p208_p7 = scmp.lt.s32.totalorder %s2222_s27, 3 }
   0xb   : > { %p2308_p6 = por %p201_p3, %p45_p0  ;;  %s2224_s10 = smov [#allocation5]  }
   0xc   : > { %s2835_s30 = scalar_select %p2303_p4, 1, 0 }
   0xd   : > { %s2836_s8 = scalar_select %p2308_p6, 1, 0 }
   0xe   : > { %p2313_p8 = pnand %p1433_p5, %p208_p7  ;;  %s220_s11 = sshll.u32 %s2224_s10, 4  ;;  %s2317_s11 = int_to_ptr.vmem [resolvable:$true] %s220_s11 }
   0xf   : > { %2837 = sst [smem:[#allocation15_spill]] %s2836_s8  ;;  %s2225_s13 = smov [#allocation7]  }
  0x10   : > { %s2838_s9 = scalar_select %p2313_p8, 1, 0 }
  0x11   : > { %p1969_p9 = pneg %p2313_p8  ;;  %s236_s14 = sshll.u32 %s2225_s13, 4  ;;  %s2328_s14 = int_to_ptr.vmem [resolvable:$true] %s236_s14 }
  0x12   : > { %s2226_s15 = smov [#allocation8]   ;;  %s2034_s19 = scalar_lea.hbm %s2824_s1, 2048 }
  0x13   : > { %p2324_p11 = pnand %p1969_p9, %p2831_p1  ;;  %s2330_s16 = sshll.u32 %s2226_s15, 4  ;;  %s253_s16 = int_to_ptr.vmem [resolvable:$true] %s2330_s16 }
  0x14   : > { %p2035_p12 = scmp.ne.s32.totalorder %s2824_s1, %s2034_s19  ;;  %p2041_p5 = scmp.lt.u32.totalorder %s2034_s19, %s2824_s1 }
  0x15   : > { %p2340_p13 = pneg %p2324_p11 }
  0x17   : > { %p2037_p0 = pnand %p2340_p13, %p2035_p12 }
  0x19   : > { %p2038_p3 = pneg %p2037_p0 }
  0x1b   : > { %p2043_p7 = pnand %p2041_p5, %p2038_p3 }
  0x1d   : > { %2046 = shalt.err (!%p2043_p7)
}
  0x1e   : > { %s2047_s10 = scalar_lea.vmem %s2317_s11, 2048  ;;  %p2055_p2 = scmp.lt.s32.totalorder %s2317_s11, %s2317_s11 }
  0x1f   : > { %p2048_p9 = scmp.ne.s32.totalorder %s2317_s11, %s2047_s10  ;;  %p2056_p6 = scmp.lt.s32.totalorder %s2047_s10, %s2047_s10 }
  0x21   : > { %p2050_p10 = pnand %p2048_p9, %p2340_p13  ;;  %p2057_p12 = por %p2056_p6, %p2055_p2 }
  0x23   : > { %p2051_p1 = pneg %p2050_p10 }
  0x25   : > { %p2058_p0 = pnand %p2057_p12, %p2051_p1 }
  0x27   : > { %2061 = shalt.err (!%p2058_p0)
}
  0x28   : > { %s2227_s13 = smov 128   ;;  %s2228_s15 = smov 8  }
  0x29   : > { %1972 = dma.hbm_to_vmem [thread:$0]  (!%p2324_p11), %s2824_s1, 2048, %s2317_s11, [#allocation6], %s2227_s13, %s2227_s13, %s2228_s15  }
  0x2a   : > { %s2062_s21 = scalar_lea.hbm %s2826_s3, 2048 }
  0x2b   : > { %p2063_p1 = scmp.ne.s32.totalorder %s2826_s3, %s2062_s21  ;;  %p2069_p10 = scmp.lt.u32.totalorder %s2062_s21, %s2826_s3 }
  0x2d   : > { %p2065_p2 = pnand %p2063_p1, %p2340_p13 }
  0x2f   : > { %p2066_p6 = pneg %p2065_p2 }
  0x31   : > { %p2071_p3 = pnand %p2069_p10, %p2066_p6 }
  0x33   : > { %2074 = shalt.err (!%p2071_p3)
}
  0x34   : > { %s2075_s11 = scalar_lea.vmem %s2328_s14, 2048  ;;  %p2083_p12 = scmp.lt.s32.totalorder %s2328_s14, %s2328_s14 }
  0x35   : > { %p2076_p5 = scmp.ne.s32.totalorder %s2328_s14, %s2075_s11  ;;  %p2084_p0 = scmp.lt.s32.totalorder %s2075_s11, %s2075_s11 }
  0x37   : > { %p2078_p7 = pnand %p2076_p5, %p2340_p13  ;;  %p2085_p1 = por %p2084_p0, %p2083_p12 }
  0x39   : > { %p2079_p9 = pneg %p2078_p7 }
  0x3b   : > { %p2086_p2 = pnand %p2085_p1, %p2079_p9 }
  0x3d   : > { %2089 = shalt.err (!%p2086_p2)
}
  0x3e   : > { %1975 = dma.hbm_to_vmem [thread:$0]  (!%p2324_p11), %s2826_s3, 2048, %s2328_s14, [#allocation6], %s2227_s13, %s2227_s13, %s2228_s15  }
  0x3f   : > { %s2090_s20 = scalar_lea.hbm %s2828_s5, 2048 }
  0x40   : > { %p2091_p6 = scmp.ne.s32.totalorder %s2828_s5, %s2090_s20  ;;  %p2097_p5 = scmp.lt.u32.totalorder %s2090_s20, %s2828_s5 }
  0x42   : > { %p2093_p10 = pnand %p2091_p6, %p2340_p13 }
  0x44   : > { %p2094_p3 = pneg %p2093_p10 }
  0x46   : > { %p2099_p7 = pnand %p2097_p5, %p2094_p3 }
  0x48   : > { %2102 = shalt.err (!%p2099_p7)
}
  0x49   : > { %s2103_s11 = scalar_lea.vmem %s253_s16, 2048  ;;  %p2111_p1 = scmp.lt.s32.totalorder %s253_s16, %s253_s16 }
  0x4a   : > { %p2104_p9 = scmp.ne.s32.totalorder %s253_s16, %s2103_s11  ;;  %p2112_p2 = scmp.lt.s32.totalorder %s2103_s11, %s2103_s11 }
  0x4c   : > { %p2106_p12 = pnand %p2104_p9, %p2340_p13  ;;  %p2113_p4 = por %p2112_p2, %p2111_p1 }
  0x4e   : > { %p2107_p0 = pneg %p2106_p12 }
  0x50   : > { %p2114_p8 = pnand %p2113_p4, %p2107_p0 }
  0x52   : > { %2117 = shalt.err (!%p2114_p8)
}
  0x53   : > { %1978 = dma.hbm_to_vmem [thread:$0]  (!%p2324_p11), %s2828_s5, 2048, %s253_s16, [#allocation9], %s2227_s13, %s2227_s13, %s2228_s15  }
  0x54   : > { %s2413_s22 = sadd.s32 1, %s2222_s27   ;;  %s32_s17 = sadd.s32 1, %s2218_s26 }
  0x55   : > { %s29_s12 = ssub.s32 %s2222_s27, %s2413_s22  ;;  %p39_p8 = scmp.ne.s32.totalorder %s2218_s26, %s2214_s25 }
  0x56   : > { %p30_p4 = scmp.eq.s32.totalorder %s29_s12, 0  ;;  %p40_p13 = scmp.eq.s32.totalorder %s2222_s27, 0 }
  0x57   : > { %p1990_p6 = scmp.lt.s32.totalorder %s2222_s27, 2  ;;  %p2841_p3 = scmp.eq.s32.totalorder %s2294_s28, 1 }
  0x58   : > { %s2423_s18 = scalar_select %p30_p4, %s2218_s26, %s32_s17  }
  0x59   : > { %p41_p10 = por %p40_p13, %p39_p8  ;;  %p2427_p5 = por %p2841_p3, %p39_p8 }
  0x5a   : > { %s269_s20 = sand.u32 1, %s2218_s26   ;;  %s1455_s21 = sshll.u32 %s2222_s27, 12 }
  0x5b   : > { %s1438_s16 = sshll.u32 %s269_s20, 8  ;;  %s2436_s10 = scalar_lea.hbm %s2823_s0, %s1455_s21 }
  0x5c   : > { %s273_s11 = scalar_lea.vmem [#allocation2], %s1438_s16  ;;  %p2438_p11 = pnand %p1990_p6, %p41_p10 }
  0x5d   : > { %s280_s14 = sshll.u32 %s273_s11, 4  ;;  %s2444_s12 = scalar_lea.sflag [#allocation3], %s269_s20  ;;  %s2442_s14 = int_to_ptr.vmem [resolvable:$true] %s280_s14 }
  0x5e   : > { %s2118_s17 = scalar_lea.hbm %s2436_s10, 4096  ;;  %p2120_p9 = pneg %p2438_p11 }
  0x5f   : > { %p2119_p7 = scmp.ne.s32.totalorder %s2436_s10, %s2118_s17  ;;  %s2123_s23 = scalar_lea.hbm %s2823_s0, 8192 }
  0x60   : > { %p2124_p1 = scmp.lt.u32.totalorder %s2436_s10, %s2823_s0  ;;  %p2125_p2 = scmp.lt.u32.totalorder %s2123_s23, %s2118_s17 }
  0x61   : > { %p2121_p12 = pnand %p2120_p9, %p2119_p7  ;;  %p2127_p8 = scmp.lt.u32.totalorder %s2118_s17, %s2436_s10 }
  0x62   : > { %p2126_p4 = por %p2125_p2, %p2124_p1 }
  0x63   : > { %p2122_p0 = pneg %p2121_p12 }
  0x64   : > { %p2128_p13 = por %p2127_p8, %p2126_p4 }
  0x66   : > { %p2129_p6 = pnand %p2128_p13, %p2122_p0 }
  0x68   : > { %2132 = shalt.err (!%p2129_p6)
}
  0x69   : > { %s2133_s20 = scalar_lea.vmem %s2442_s14, 4096  ;;  %s2229_s21 = smov [#allocation2]  }
  0x6a   : > { %p2134_p10 = scmp.ne.s32.totalorder %s2442_s14, %s2133_s20  ;;  %s2138_s16 = sshll.u32 %s2229_s21, 4  ;;  %s2139_s16 = int_to_ptr.vmem [resolvable:$false] %s2138_s16 }
  0x6b   : > { %s2140_s29 = scalar_lea.vmem %s2139_s16, 8192  ;;  %p2141_p12 = scmp.lt.s32.totalorder %s2442_s14, %s2139_s16 }
  0x6c   : > { %p2136_p3 = pnand %p2134_p10, %p2120_p9  ;;  %p2142_p1 = scmp.lt.s32.totalorder %s2140_s29, %s2133_s20 }
  0x6e   : > { %p2137_p7 = pneg %p2136_p3  ;;  %p2143_p2 = por %p2142_p1, %p2141_p12 }
  0x70   : > { %p2144_p4 = pnand %p2143_p2, %p2137_p7 }
  0x72   : > { %2147 = shalt.err (!%p2144_p4)
}
  0x73   : > { %1982 = dma.hbm_to_vmem [thread:$0]  (!%p2438_p11), %s2436_s10, 4096, %s2442_s14, %s2444_s12, %s2227_s13, %s2227_s13, %s2228_s15  }
  0x74   : > { %p2844_p9 = scmp.ne.s32.totalorder %s2838_s9, 0 }
  0x75   : > { %s2478_s17 = sand.u32 (!%p2844_p9), 1, %s2214_s25   ;;  %p2845_p0 = scmp.ne.s32.totalorder (!%p2844_p9), %s2835_s30, 0 }
  0x76   : > { %292 = sbr.rel (%p2844_p9) target bundleno = 899 (0x383), region = 48  ;;  %s1442_s23 = sshll.u32 (!%p2844_p9), %s2478_s17, 8 }
  0x77   : > { %s295_s11 = scalar_lea.sflag (!%p2844_p9), [#allocation3], %s2478_s17  ;;  %s2484_s8 = scalar_lea.vmem (!%p2844_p9), [#allocation2], %s1442_s23 }
  0x7d   : > { %2193 = dma.done.wait (%p2845_p0), %s295_s11, 4096  }
  0x7e   : > { %2195 = vsyncadd (%p2845_p0), %s295_s11, 4294963200  ;;  %p2846_p11 = scmp.eq.s32.totalorder %s2294_s28, 0 }
  0x80   : > { %2197 = dma.done.wait (%p2846_p11), [#allocation6], 4096   ;;  %p2847_p8 = pmov %p2846_p11 }
  0x82   : > { %2199 = vsyncadd (%p2847_p8), [#allocation6], 4294963200  ;;  %p2848_p13 = pmov %p2847_p8 }
  0x83   : > { %p2849_p6 = pmov %p2847_p8 }
  0x84   : > { %2201 = dma.done.wait (%p2848_p13), [#allocation9], 2048  }
  0x85   : > { %2203 = vsyncadd (%p2849_p6), [#allocation9], 4294965248  ;;  %v375_v0 = vld [vmem:[#allocation5] sm:$0xff]  ;;  %v376_v1 = vld [vmem:[#allocation5 + $0x8] sm:$0xff]  ;;  %s2648_s12 = scalar_lea.vmem [#allocation10], %s1442_s23  ;;  %s1456_s20 = sshll.u32 %s2294_s28, 12 }
  0x86   : > { %v377_v2 = vld [vmem:[#allocation5 + $0x10] sm:$0xff]  ;;  %v1841_v3 = vpack.c.bf16 %v376_v1, %v375_v0  ;;  %v378_v4 = vld [vmem:[#allocation5 + $0x18] sm:$0xff]  ;;  %v379_v6 = vld [vmem:[#allocation5 + $0x20] sm:$0xff]  ;;  %s1330_s21 = sshll.u32 %s2648_s12, 4  ;;  %s2771_s23 = scalar_lea.hbm %s2830_s7, %s1456_s20  ;;  %s2773_s21 = int_to_ptr.vmem [resolvable:$true] %s1330_s21 }
  0x87   : > { %v1845_v5 = vpack.c.bf16 %v378_v4, %v377_v2  ;;  %v380_v7 = vld [vmem:[#allocation5 + $0x28] sm:$0xff]  ;;  %v343_v9 = vld [vmem:[%s2484_s8] sm:$0xff]  ;;  %v381_v10 = vld [vmem:[#allocation5 + $0x30] sm:$0xff]  ;;  %s1317_s28 = scalar_lea.sflag [#allocation4], %s2478_s17  ;;  %s2148_s11 = scalar_lea.vmem %s2773_s21, 4096 }
  0x88   : > { %1842 = vmatprep.subr.bf16.mxu0 %v1841_v3  ;;  %1937 = vmatprep.subr.bf16.mxu1 %v1841_v3  ;;  %v1849_v8 = vpack.c.bf16 %v380_v7, %v379_v6  ;;  %v382_v11 = vld [vmem:[#allocation5 + $0x38] sm:$0xff]  ;;  %v383_v13 = vld [vmem:[#allocation5 + $0x40] sm:$0xff]  ;;  %v384_v14 = vld [vmem:[#allocation5 + $0x48] sm:$0xff]  ;;  %p2149_p10 = scmp.ne.s32.totalorder %s2773_s21, %s2148_s11 }
  0x89   : > { %1844 = vmatpush3.bf16.msra.mxu0 %v1841_v3  ;;  %1945 = vmatpush3.bf16.msra.mxu1 %v1841_v3  ;;  %v1853_v12 = vpack.c.bf16 %v382_v11, %v381_v10  ;;  %v359_v15 = vld [vmem:[%s2484_s8 + $0x80] sm:$0xff]  ;;  %v1857_v16 = vpack.c.bf16 %v384_v14, %v383_v13  ;;  %v385_v17 = vld [vmem:[#allocation5 + $0x50] sm:$0xff]  ;;  %v386_v18 = vld [vmem:[#allocation5 + $0x58] sm:$0xff] }
  0x8a   : > { %1846 = vmatprep.subr.bf16.mxu0 %v1845_v5  ;;  %1938 = vmatprep.subr.bf16.mxu1 %v1845_v5  ;;  %v1861_v19 = vpack.c.bf16 %v386_v18, %v385_v17  ;;  %v387_v20 = vld [vmem:[#allocation5 + $0x60] sm:$0xff]  ;;  %v388_v21 = vld [vmem:[#allocation5 + $0x68] sm:$0xff]  ;;  %v389_v23 = vld [vmem:[#allocation5 + $0x70] sm:$0xff]  ;;  %p2150_p3 = pnand %p2149_p10, %p2427_p5 }
  0x8b   : > { %1633 = vmatprep.mubr.f32.mxu0 %v343_v9  ;;  %1657 = vmatprep.mubr.f32.mxu1 %v359_v15  ;;  %v1865_v22 = vpack.c.bf16 %v388_v21, %v387_v20  ;;  %v390_v24 = vld [vmem:[#allocation5 + $0x78] sm:$0xff]  ;;  %v655_v26 = vld [vmem:[#allocation7] sm:$0xff]  ;;  %v656_v27 = vld [vmem:[#allocation7 + $0x8] sm:$0xff] }
  0x8c   : > { %v1869_v25 = vpack.c.bf16 %v390_v24, %v389_v23  ;;  %v1873_v28 = vpack.c.bf16 %v656_v27, %v655_v26  ;;  %v657_v29 = vld [vmem:[#allocation7 + $0x10] sm:$0xff]  ;;  %v658_v30 = vld [vmem:[#allocation7 + $0x18] sm:$0xff]  ;;  %v344_v31 = vld [vmem:[%s2484_s8 + $0x8] sm:$0xff]  ;;  %p2151_p7 = pneg %p2150_p3 }
  0x8d   : > { %1848 = vmatpush3.bf16.msra.mxu0 %v1845_v5  ;;  %1946 = vmatpush3.bf16.msra.mxu1 %v1845_v5  ;;  %v360_v32 = vld [vmem:[%s2484_s8 + $0x88] sm:$0xff]  ;;  %v345_v33 = vld [vmem:[%s2484_s8 + $0x10] sm:$0xff]  ;;  %v1877_v35 = vpack.c.bf16 %v658_v30, %v657_v29  ;;  %v659_v36 = vld [vmem:[#allocation7 + $0x20] sm:$0xff] }
  0x8e   : > { %1850 = vmatprep.subr.bf16.mxu0 %v1849_v8  ;;  %1939 = vmatprep.subr.bf16.mxu1 %v1849_v8  ;;  %v361_v34 = vld [vmem:[%s2484_s8 + $0x90] sm:$0xff]  ;;  %v660_v37 = vld [vmem:[#allocation7 + $0x28] sm:$0xff]  ;;  %v346_v38 = vld [vmem:[%s2484_s8 + $0x18] sm:$0xff] }
  0x8f   : > { %v362_v39 = vld [vmem:[%s2484_s8 + $0x98] sm:$0xff]  ;;  %v347_v40 = vld [vmem:[%s2484_s8 + $0x20] sm:$0xff]  ;;  %v1881_v42 = vpack.c.bf16 %v660_v37, %v659_v36  ;;  %v661_v43 = vld [vmem:[#allocation7 + $0x30] sm:$0xff] }
  0x90   : > { %v363_v41 = vld [vmem:[%s2484_s8 + $0xa0] sm:$0xff]  ;;  %v662_v44 = vld [vmem:[#allocation7 + $0x38] sm:$0xff]  ;;  %v348_v45 = vld [vmem:[%s2484_s8 + $0x28] sm:$0xff] }
  0x91   : > { %1852 = vmatpush3.bf16.msra.mxu0 %v1849_v8  ;;  %1947 = vmatpush3.bf16.msra.mxu1 %v1849_v8  ;;  %v364_v46 = vld [vmem:[%s2484_s8 + $0xa8] sm:$0xff]  ;;  %v349_v47 = vld [vmem:[%s2484_s8 + $0x30] sm:$0xff]  ;;  %v1885_v49 = vpack.c.bf16 %v662_v44, %v661_v43  ;;  %v663_v50 = vld [vmem:[#allocation7 + $0x40] sm:$0xff] }
  0x92   : > { %1854 = vmatprep.subr.bf16.mxu0 %v1853_v12  ;;  %1940 = vmatprep.subr.bf16.mxu1 %v1853_v12  ;;  %v365_v48 = vld [vmem:[%s2484_s8 + $0xb0] sm:$0xff]  ;;  %v664_v51 = vld [vmem:[#allocation7 + $0x48] sm:$0xff]  ;;  %v350_v52 = vld [vmem:[%s2484_s8 + $0x38] sm:$0xff] }
  0x93   : > { %v366_v53 = vld [vmem:[%s2484_s8 + $0xb8] sm:$0xff]  ;;  %v351_v54 = vld [vmem:[%s2484_s8 + $0x40] sm:$0xff]  ;;  %v1889_v56 = vpack.c.bf16 %v664_v51, %v663_v50  ;;  %v665_v57 = vld [vmem:[#allocation7 + $0x50] sm:$0xff] }
  0x94   : > { %v367_v55 = vld [vmem:[%s2484_s8 + $0xc0] sm:$0xff]  ;;  %v666_v58 = vld [vmem:[#allocation7 + $0x58] sm:$0xff]  ;;  %v352_v59 = vld [vmem:[%s2484_s8 + $0x48] sm:$0xff] }
  0x95   : > { %1856 = vmatpush3.bf16.msra.mxu0 %v1853_v12  ;;  %1948 = vmatpush3.bf16.msra.mxu1 %v1853_v12  ;;  %v368_v60 = vld [vmem:[%s2484_s8 + $0xc8] sm:$0xff]  ;;  %v353_v61 = vld [vmem:[%s2484_s8 + $0x50] sm:$0xff]  ;;  %v1893_v63 = vpack.c.bf16 %v666_v58, %v665_v57  ;;  %v667_v0 = vld [vmem:[#allocation7 + $0x60] sm:$0xff] }
  0x96   : > { %1858 = vmatprep.subr.bf16.mxu0 %v1857_v16  ;;  %1941 = vmatprep.subr.bf16.mxu1 %v1857_v16  ;;  %v369_v62 = vld [vmem:[%s2484_s8 + $0xd0] sm:$0xff]  ;;  %v668_v1 = vld [vmem:[#allocation7 + $0x68] sm:$0xff]  ;;  %v354_v2 = vld [vmem:[%s2484_s8 + $0x58] sm:$0xff] }
  0x97   : > { %v370_v3 = vld [vmem:[%s2484_s8 + $0xd8] sm:$0xff]  ;;  %v355_v4 = vld [vmem:[%s2484_s8 + $0x60] sm:$0xff]  ;;  %v1897_v6 = vpack.c.bf16 %v668_v1, %v667_v0  ;;  %v356_v7 = vld [vmem:[%s2484_s8 + $0x68] sm:$0xff] }
  0x98   : > { %v371_v5 = vld [vmem:[%s2484_s8 + $0xe0] sm:$0xff]  ;;  %v372_v8 = vld [vmem:[%s2484_s8 + $0xe8] sm:$0xff]  ;;  %v357_v9 = vld [vmem:[%s2484_s8 + $0x70] sm:$0xff] }
  0x99   : > { %1860 = vmatpush3.bf16.msra.mxu0 %v1857_v16  ;;  %1949 = vmatpush3.bf16.msra.mxu1 %v1857_v16  ;;  %v373_v10 = vld [vmem:[%s2484_s8 + $0xf0] sm:$0xff]  ;;  %v358_v11 = vld [vmem:[%s2484_s8 + $0x78] sm:$0xff]  ;;  %v935_v16 = vld [vmem:[#allocation8] sm:$0xff] }
  0x9a   : > { %1862 = vmatprep.subr.bf16.mxu0 %v1861_v19  ;;  %1942 = vmatprep.subr.bf16.mxu1 %v1861_v19  ;;  %v374_v12 = vld [vmem:[%s2484_s8 + $0xf8] sm:$0xff]  ;;  %v669_v13 = vld [vmem:[#allocation7 + $0x70] sm:$0xff]  ;;  %v936_v17 = vld [vmem:[#allocation8 + $0x8] sm:$0xff]  ;;  %s2230_s8 = smov [#allocation10]  }
  0x9b   : > { %v670_v14 = vld [vmem:[#allocation7 + $0x78] sm:$0xff]  ;;  %v937_v18 = vld [vmem:[#allocation8 + $0x10] sm:$0xff]  ;;  %v940_v23 = vld [vmem:[#allocation8 + $0x28] sm:$0xff]  ;;  %s2152_s30 = sshll.u32 %s2230_s8, 4  ;;  %s2153_s30 = int_to_ptr.vmem [resolvable:$false] %s2152_s30 }
  0x9c   : > { %v1901_v15 = vpack.c.bf16 %v670_v14, %v669_v13  ;;  %v938_v20 = vld [vmem:[#allocation8 + $0x18] sm:$0xff]  ;;  %v944_v29 = vld [vmem:[#allocation8 + $0x48] sm:$0xff]  ;;  %v2533_v37 = vld [vmem:[%s2825_s2] ss:$0 sm:$0xff]  ;;  %s2154_s9 = scalar_lea.vmem %s2153_s30, 8192  ;;  %p2155_p12 = scmp.lt.s32.totalorder %s2773_s21, %s2153_s30 }
  0x9d   : > { %1864 = vmatpush3.bf16.msra.mxu0 %v1861_v19  ;;  %1950 = vmatpush3.bf16.msra.mxu1 %v1861_v19  ;;  %v1905_v19 = vpack.c.bf16 %v936_v17, %v935_v16  ;;  %v1909_v21 = vpack.c.bf16 %v938_v20, %v937_v18  ;;  %v942_v26 = vld [vmem:[#allocation8 + $0x38] sm:$0xff]  ;;  %p2156_p1 = scmp.lt.s32.totalorder %s2154_s9, %s2148_s11 }
  0x9e   : > { %1866 = vmatprep.subr.bf16.mxu0 %v1865_v22  ;;  %1943 = vmatprep.subr.bf16.mxu1 %v1865_v22 }
  0x9f   : > { %p2157_p2 = por %p2156_p1, %p2155_p12 }
  0xa1   : > { %1868 = vmatpush3.bf16.msra.mxu0 %v1865_v22  ;;  %1951 = vmatpush3.bf16.msra.mxu1 %v1865_v22  ;;  %v939_v22 = vld [vmem:[#allocation8 + $0x20] sm:$0xff]  ;;  %p2158_p4 = pnand %p2157_p2, %p2151_p7 }
  0xa2   : > { %1870 = vmatprep.subr.bf16.mxu0 %v1869_v25  ;;  %1944 = vmatprep.subr.bf16.mxu1 %v1869_v25  ;;  %v1913_v24 = vpack.c.bf16 %v940_v23, %v939_v22 }
  0xa5   : > { %1872 = vmatpush3.bf16.msra.mxu0 %v1869_v25  ;;  %1952 = vmatpush3.bf16.msra.mxu1 %v1869_v25  ;;  %v941_v25 = vld [vmem:[#allocation8 + $0x30] sm:$0xff] }
  0xa6   : > { %1874 = vmatprep.subr.bf16.mxu1 %v1873_v28  ;;  %1906 = vmatprep.subr.bf16.mxu0 %v1905_v19  ;;  %v1917_v27 = vpack.c.bf16 %v942_v26, %v941_v25 }
  0xa8   : > { %1634 = vmatmul.mubr.f32.vlgmr.msra.gmra.mrb[0].mxu0 %v344_v31  ;;  %1658 = vmatmul.mubr.f32.vlgmr.msra.gmra.mrb[0].mxu1 %v360_v32  ;;  %v945_v31 = vld [vmem:[#allocation8 + $0x50] sm:$0xff]  ;;  %v946_v32 = vld [vmem:[#allocation8 + $0x58] sm:$0xff] }
  0xa9   : > { %1636 = vmatprep.mubr.f32.mxu0 %v345_v33  ;;  %1660 = vmatprep.mubr.f32.mxu1 %v361_v34  ;;  %v1925_v33 = vpack.c.bf16 %v946_v32, %v945_v31  ;;  %v947_v34 = vld [vmem:[#allocation8 + $0x60] sm:$0xff] }
  0xaa   : > { %1876 = vmatpush3.bf16.msra.mxu1 %v1873_v28  ;;  %1908 = vmatpush3.bf16.msra.mxu0 %v1905_v19  ;;  %v943_v28 = vld [vmem:[#allocation8 + $0x40] sm:$0xff] }
  0xab   : > { %1878 = vmatprep.subr.bf16.mxu1 %v1877_v35  ;;  %1910 = vmatprep.subr.bf16.mxu0 %v1909_v21  ;;  %v1921_v30 = vpack.c.bf16 %v944_v29, %v943_v28 }
  0xac   : > { %1637 = vmatmul.mubr.f32.gmra.mrb[2].mxu0 %v346_v38  ;;  %1661 = vmatmul.mubr.f32.gmra.mrb[2].mxu1 %v362_v39 }
  0xad   : > { %1639 = vmatprep.mubr.f32.mxu0 %v347_v40  ;;  %1663 = vmatprep.mubr.f32.mxu1 %v363_v41 }
  0xae   : > { %1880 = vmatpush3.bf16.msra.mxu1 %v1877_v35  ;;  %1912 = vmatpush3.bf16.msra.mxu0 %v1909_v21  ;;  %v948_v35 = vld [vmem:[#allocation8 + $0x68] sm:$0xff] }
  0xaf   : > { %1882 = vmatprep.subr.bf16.mxu1 %v1881_v42  ;;  %1914 = vmatprep.subr.bf16.mxu0 %v1913_v24  ;;  %v1929_v36 = vpack.c.bf16 %v948_v35, %v947_v34 }
  0xb0   : > { %1640 = vmatmul.mubr.f32.gmra.mrb[4].mxu0 %v348_v45  ;;  %1664 = vmatmul.mubr.f32.gmra.mrb[4].mxu1 %v364_v46 }
  0xb1   : > { %1642 = vmatprep.mubr.f32.mxu0 %v349_v47  ;;  %1666 = vmatprep.mubr.f32.mxu1 %v365_v48 }
  0xb2   : > { %1884 = vmatpush3.bf16.msra.mxu1 %v1881_v42  ;;  %1916 = vmatpush3.bf16.msra.mxu0 %v1913_v24 }
  0xb3   : > { %1886 = vmatprep.subr.bf16.mxu1 %v1885_v49  ;;  %1918 = vmatprep.subr.bf16.mxu0 %v1917_v27 }
  0xb4   : > { %1643 = vmatmul.mubr.f32.gmra.mrb[6].mxu0 %v350_v52  ;;  %1667 = vmatmul.mubr.f32.gmra.mrb[6].mxu1 %v366_v53 }
  0xb5   : > { %1645 = vmatprep.mubr.f32.mxu0 %v351_v54  ;;  %1669 = vmatprep.mubr.f32.mxu1 %v367_v55 }
  0xb6   : > { %1888 = vmatpush3.bf16.msra.mxu1 %v1885_v49  ;;  %1920 = vmatpush3.bf16.msra.mxu0 %v1917_v27 }
  0xb7   : > { %1890 = vmatprep.subr.bf16.mxu1 %v1889_v56  ;;  %1922 = vmatprep.subr.bf16.mxu0 %v1921_v30 }
  0xb8   : > { %1646 = vmatmul.mubr.f32.gmra.mrb[8].mxu0 %v352_v59  ;;  %1670 = vmatmul.mubr.f32.gmra.mrb[8].mxu1 %v368_v60 }
  0xb9   : > { %1648 = vmatprep.mubr.f32.mxu0 %v353_v61  ;;  %1672 = vmatprep.mubr.f32.mxu1 %v369_v62 }
  0xba   : > { %1892 = vmatpush3.bf16.msra.mxu1 %v1889_v56  ;;  %1924 = vmatpush3.bf16.msra.mxu0 %v1921_v30 }
  0xbb   : > { %1894 = vmatprep.subr.bf16.mxu1 %v1893_v63  ;;  %1926 = vmatprep.subr.bf16.mxu0 %v1925_v33 }
  0xbc   : > { %1649 = vmatmul.mubr.f32.gmra.mrb[10].mxu0 %v354_v2  ;;  %1673 = vmatmul.mubr.f32.gmra.mrb[10].mxu1 %v370_v3 }
  0xbd   : > { %1651 = vmatprep.mubr.f32.mxu0 %v355_v4  ;;  %1675 = vmatprep.mubr.f32.mxu1 %v371_v5 }
  0xbe   : > { %1896 = vmatpush3.bf16.msra.mxu1 %v1893_v63  ;;  %1928 = vmatpush3.bf16.msra.mxu0 %v1925_v33 }
  0xbf   : > { %1898 = vmatprep.subr.bf16.mxu1 %v1897_v6  ;;  %1930 = vmatprep.subr.bf16.mxu0 %v1929_v36 }
  0xc0   : > { %1652 = vmatmul.mubr.f32.gmra.mrb[12].mxu0 %v356_v7  ;;  %1676 = vmatmul.mubr.f32.gmra.mrb[12].mxu1 %v372_v8 }
  0xc1   : > { %1654 = vmatprep.mubr.f32.mxu0 %v357_v9  ;;  %1678 = vmatprep.mubr.f32.mxu1 %v373_v10 }
  0xc2   : > { %1900 = vmatpush3.bf16.msra.mxu1 %v1897_v6  ;;  %1932 = vmatpush3.bf16.msra.mxu0 %v1929_v36 }
  0xc3   : > { %1902 = vmatprep.subr.bf16.mxu1 %v1901_v15 }
  0xc4   : > { %1655 = vmatmul.mubr.f32.gmra.mrb[14].mxu0 %v358_v11  ;;  %1679 = vmatmul.mubr.f32.gmra.mrb[14].mxu1 %v374_v12 }
  0xc6   : > { %1904 = vmatpush3.bf16.msra.mxu1 %v1901_v15 }
 0x17b   : > { %v1635_v38 = vpop.f32.mrb[0].mxu0  ;;  %v2535_v39 = vpop.f32.mrb[0].mxu1 }
 0x17c   : > { %v470_v40 = vadd.f32 %v1635_v38, %v2533_v37  ;;  %v464_v41 = vpop.f32.mrb[1].mxu0  ;;  %v2538_v42 = vpop.f32.mrb[1].mxu1 }
 0x17d   : > { %v465_v43 = vadd.f32 %v2533_v37, %v464_v41  ;;  %v545_v30 = vadd.f32 %v2533_v37, %v2538_v42 }
 0x17e   : > { %v624_v47 = vmax.f32 %v470_v40, 0.0 }
 0x17f   : > { %v623_v44 = vmax.f32 %v465_v43, 0.0  ;;  %v1638_v45 = vpop.f32.mrb[2].mxu0  ;;  %v2541_v46 = vpop.f32.mrb[2].mxu1  ;;  %v639_v40 = vmax.f32 %v545_v30, 0.0 }
 0x180   : > { %v480_v48 = vadd.f32 %v1638_v45, %v2533_v37  ;;  %v474_v49 = vpop.f32.mrb[3].mxu0  ;;  %v2544_v50 = vpop.f32.mrb[3].mxu1 }
 0x181   : > { %v475_v51 = vadd.f32 %v2533_v37, %v474_v49  ;;  %1713 = vmatprep.mubr.f32.mxu1 %v623_v44  ;;  %v555_v41 = vadd.f32 %v2533_v37, %v2544_v50  ;;  %v550_v44 = vadd.f32 %v2535_v39, %v2533_v37 }
 0x182   : > { %1714 = vmatmul.mubr.f32.vlgmr.msra.gmra.mrb[16].mxu1 %v624_v47  ;;  %v626_v55 = vmax.f32 %v480_v48, 0.0  ;;  %v560_v48 = vadd.f32 %v2541_v46, %v2533_v37 }
 0x183   : > { %v625_v52 = vmax.f32 %v475_v51, 0.0  ;;  %v1641_v53 = vpop.f32.mrb[4].mxu0  ;;  %v2547_v54 = vpop.f32.mrb[4].mxu1  ;;  %v641_v42 = vmax.f32 %v555_v41, 0.0  ;;  %v640_v47 = vmax.f32 %v550_v44, 0.0 }
 0x184   : > { %v490_v56 = vadd.f32 %v1641_v53, %v2533_v37  ;;  %v484_v57 = vpop.f32.mrb[5].mxu0  ;;  %v2550_v58 = vpop.f32.mrb[5].mxu1  ;;  %v642_v51 = vmax.f32 %v560_v48, 0.0  ;;  %v570_v39 = vadd.f32 %v2547_v54, %v2533_v37 }
 0x185   : > { %v485_v59 = vadd.f32 %v2533_v37, %v484_v57  ;;  %1716 = vmatprep.mubr.f32.mxu1 %v625_v52  ;;  %v565_v45 = vadd.f32 %v2533_v37, %v2550_v58 }
 0x186   : > { %1717 = vmatmul.mubr.f32.gmra.mrb[18].mxu1 %v626_v55  ;;  %v628_v63 = vmax.f32 %v490_v56, 0.0  ;;  %v644_v55 = vmax.f32 %v570_v39, 0.0 }
 0x187   : > { %v627_v60 = vmax.f32 %v485_v59, 0.0  ;;  %v1644_v61 = vpop.f32.mrb[6].mxu0  ;;  %v2553_v62 = vpop.f32.mrb[6].mxu1  ;;  %v643_v49 = vmax.f32 %v565_v45, 0.0 }
 0x188   : > { %v500_v0 = vadd.f32 %v1644_v61, %v2533_v37  ;;  %v494_v1 = vpop.f32.mrb[7].mxu0  ;;  %v574_v2 = vpop.f32.mrb[7].mxu1  ;;  %v580_v56 = vadd.f32 %v2553_v62, %v2533_v37 }
 0x189   : > { %v495_v3 = vadd.f32 %v2533_v37, %v494_v1  ;;  %1719 = vmatprep.mubr.f32.mxu1 %v627_v60  ;;  %v575_v50 = vadd.f32 %v2533_v37, %v574_v2 }
 0x18a   : > { %1720 = vmatmul.mubr.f32.gmra.mrb[20].mxu1 %v628_v63  ;;  %v630_v7 = vmax.f32 %v500_v0, 0.0  ;;  %v646_v58 = vmax.f32 %v580_v56, 0.0 }
 0x18b   : > { %v629_v4 = vmax.f32 %v495_v3, 0.0  ;;  %v1647_v5 = vpop.f32.mrb[8].mxu0  ;;  %v2557_v6 = vpop.f32.mrb[8].mxu1  ;;  %v645_v52 = vmax.f32 %v575_v50, 0.0 }
 0x18c   : > { %v510_v8 = vadd.f32 %v1647_v5, %v2533_v37  ;;  %v504_v9 = vpop.f32.mrb[9].mxu0  ;;  %v584_v10 = vpop.f32.mrb[9].mxu1  ;;  %v590_v59 = vadd.f32 %v2557_v6, %v2533_v37 }
 0x18d   : > { %v505_v11 = vadd.f32 %v2533_v37, %v504_v9  ;;  %1722 = vmatprep.mubr.f32.mxu1 %v629_v4  ;;  %v585_v53 = vadd.f32 %v2533_v37, %v584_v10  ;;  %v2597_v10 = vld [vmem:[%s2827_s4] ss:$0 sm:$0xff] }
 0x18e   : > { %1723 = vmatmul.mubr.f32.gmra.mrb[22].mxu1 %v630_v7  ;;  %v632_v15 = vmax.f32 %v510_v8, 0.0  ;;  %v648_v61 = vmax.f32 %v590_v59, 0.0  ;;  %v949_v7 = vld [vmem:[#allocation8 + $0x70] sm:$0xff]  ;;  %v950_v8 = vld [vmem:[#allocation8 + $0x78] sm:$0xff] }
 0x18f   : > { %v631_v12 = vmax.f32 %v505_v11, 0.0  ;;  %v1650_v13 = vpop.f32.mrb[10].mxu0  ;;  %v2561_v14 = vpop.f32.mrb[10].mxu1  ;;  %v647_v46 = vmax.f32 %v585_v53, 0.0  ;;  %v1933_v9 = vpack.c.bf16 %v950_v8, %v949_v7 }
 0x190   : > { %v520_v16 = vadd.f32 %v1650_v13, %v2533_v37  ;;  %v514_v17 = vpop.f32.mrb[11].mxu0  ;;  %v594_v18 = vpop.f32.mrb[11].mxu1  ;;  %v600_v63 = vadd.f32 %v2561_v14, %v2533_v37 }
 0x191   : > { %v515_v19 = vadd.f32 %v2533_v37, %v514_v17  ;;  %1725 = vmatprep.mubr.f32.mxu1 %v631_v12  ;;  %v595_v57 = vadd.f32 %v2533_v37, %v594_v18  ;;  %1934 = vmatprep.subr.bf16.mxu0 %v1933_v9 }
 0x192   : > { %1726 = vmatmul.mubr.f32.gmra.mrb[24].mxu1 %v632_v15  ;;  %v634_v23 = vmax.f32 %v520_v16, 0.0  ;;  %v650_v1 = vmax.f32 %v600_v63, 0.0  ;;  %1936 = vmatpush3.bf16.msra.mxu0 %v1933_v9 }
 0x193   : > { %v633_v20 = vmax.f32 %v515_v19, 0.0  ;;  %v1653_v21 = vpop.f32.mrb[12].mxu0  ;;  %v1677_v22 = vpop.f32.mrb[12].mxu1  ;;  %v649_v54 = vmax.f32 %v595_v57, 0.0 }
 0x194   : > { %v530_v24 = vadd.f32 %v1653_v21, %v2533_v37  ;;  %v524_v25 = vpop.f32.mrb[13].mxu0  ;;  %v604_v26 = vpop.f32.mrb[13].mxu1  ;;  %v610_v2 = vadd.f32 %v1677_v22, %v2533_v37 }
 0x195   : > { %v525_v27 = vadd.f32 %v2533_v37, %v524_v25  ;;  %1728 = vmatprep.mubr.f32.mxu1 %v633_v20  ;;  %v605_v60 = vadd.f32 %v2533_v37, %v604_v26 }
 0x196   : > { %1729 = vmatmul.mubr.f32.gmra.mrb[26].mxu1 %v634_v23  ;;  %v636_v32 = vmax.f32 %v530_v24, 0.0  ;;  %v652_v4 = vmax.f32 %v610_v2, 0.0 }
 0x197   : > { %v635_v28 = vmax.f32 %v525_v27, 0.0  ;;  %v1656_v29 = vpop.f32.mrb[14].mxu0  ;;  %v1680_v31 = vpop.f32.mrb[14].mxu1  ;;  %v651_v62 = vmax.f32 %v605_v60, 0.0 }
 0x198   : > { %v540_v33 = vadd.f32 %v1656_v29, %v2533_v37  ;;  %v534_v34 = vpop.f32.mrb[15].mxu0  ;;  %v614_v35 = vpop.f32.mrb[15].mxu1  ;;  %v620_v5 = vadd.f32 %v1680_v31, %v2533_v37 }
 0x199   : > { %v535_v36 = vadd.f32 %v2533_v37, %v534_v34  ;;  %1731 = vmatprep.mubr.f32.mxu1 %v635_v28  ;;  %v615_v0 = vadd.f32 %v2533_v37, %v614_v35 }
 0x19a   : > { %1732 = vmatmul.mubr.f32.gmra.mrb[28].mxu1 %v636_v32  ;;  %v638_v43 = vmax.f32 %v540_v33, 0.0  ;;  %v654_v6 = vmax.f32 %v620_v5, 0.0 }
 0x19b   : > { %v637_v38 = vmax.f32 %v535_v36, 0.0  ;;  %v653_v3 = vmax.f32 %v615_v0, 0.0 }
 0x19d   : > { %1734 = vmatprep.mubr.f32.mxu1 %v637_v38 }
 0x19e   : > { %1735 = vmatmul.mubr.f32.gmra.mrb[30].mxu1 %v638_v43 }
 0x19f   : > { %1737 = vmatprep.mubr.f32.mxu1 %v639_v40 }
 0x1a2   : > { %1738 = vmatmul.mubr.f32.gmra.mrb[32].mxu1 %v640_v47 }
 0x1a3   : > { %1740 = vmatprep.mubr.f32.mxu1 %v641_v42 }
 0x1a6   : > { %1741 = vmatmul.mubr.f32.gmra.mrb[34].mxu1 %v642_v51 }
 0x1a7   : > { %1743 = vmatprep.mubr.f32.mxu1 %v643_v49 }
 0x1aa   : > { %1744 = vmatmul.mubr.f32.gmra.mrb[36].mxu1 %v644_v55 }
 0x1ab   : > { %1746 = vmatprep.mubr.f32.mxu1 %v645_v52 }
 0x1ae   : > { %1747 = vmatmul.mubr.f32.gmra.mrb[38].mxu1 %v646_v58 }
 0x1af   : > { %1749 = vmatprep.mubr.f32.mxu1 %v647_v46 }
 0x1b2   : > { %1750 = vmatmul.mubr.f32.gmra.mrb[40].mxu1 %v648_v61 }
 0x1b3   : > { %1752 = vmatprep.mubr.f32.mxu1 %v649_v54 }
 0x1b6   : > { %1753 = vmatmul.mubr.f32.gmra.mrb[42].mxu1 %v650_v1 }
 0x1b7   : > { %1755 = vmatprep.mubr.f32.mxu1 %v651_v62 }
 0x1ba   : > { %1756 = vmatmul.mubr.f32.gmra.mrb[44].mxu1 %v652_v4 }
 0x1bb   : > { %1758 = vmatprep.mubr.f32.mxu1 %v653_v3 }
 0x1be   : > { %1759 = vmatmul.mubr.f32.gmra.mrb[46].mxu1 %v654_v6 }
 0x255   : > { %v1715_v11 = vpop.f32.mrb[16].mxu1 }
 0x256   : > { %v750_v12 = vadd.f32 %v1715_v11, %v2597_v10  ;;  %v744_v13 = vpop.f32.mrb[17].mxu1 }
 0x257   : > { %v745_v37 = vadd.f32 %v2597_v10, %v744_v13 }
 0x258   : > { %v904_v16 = vmax.f32 %v750_v12, 0.0 }
 0x259   : > { %v903_v14 = vmax.f32 %v745_v37, 0.0  ;;  %v1718_v15 = vpop.f32.mrb[18].mxu1 }
 0x25a   : > { %v760_v17 = vadd.f32 %v1718_v15, %v2597_v10  ;;  %v754_v18 = vpop.f32.mrb[19].mxu1 }
 0x25b   : > { %v755_v19 = vadd.f32 %v2597_v10, %v754_v18  ;;  %1793 = vmatprep.mubr.f32.mxu0 %v903_v14 }
 0x25c   : > { %1794 = vmatmul.mubr.f32.vlgmr.msra.gmra.mrb[16].mxu0 %v904_v16  ;;  %v906_v22 = vmax.f32 %v760_v17, 0.0 }
 0x25d   : > { %v905_v20 = vmax.f32 %v755_v19, 0.0  ;;  %v1721_v21 = vpop.f32.mrb[20].mxu1 }
 0x25e   : > { %v770_v23 = vadd.f32 %v1721_v21, %v2597_v10  ;;  %v764_v24 = vpop.f32.mrb[21].mxu1 }
 0x25f   : > { %v765_v25 = vadd.f32 %v2597_v10, %v764_v24  ;;  %1796 = vmatprep.mubr.f32.mxu0 %v905_v20 }
 0x260   : > { %1797 = vmatmul.mubr.f32.gmra.mrb[18].mxu0 %v906_v22  ;;  %v908_v28 = vmax.f32 %v770_v23, 0.0 }
 0x261   : > { %v907_v26 = vmax.f32 %v765_v25, 0.0  ;;  %v1724_v27 = vpop.f32.mrb[22].mxu1 }
 0x262   : > { %v780_v29 = vadd.f32 %v1724_v27, %v2597_v10  ;;  %v774_v30 = vpop.f32.mrb[23].mxu1 }
 0x263   : > { %v775_v31 = vadd.f32 %v2597_v10, %v774_v30  ;;  %1799 = vmatprep.mubr.f32.mxu0 %v907_v26 }
 0x264   : > { %1800 = vmatmul.mubr.f32.gmra.mrb[20].mxu0 %v908_v28  ;;  %v910_v34 = vmax.f32 %v780_v29, 0.0 }
 0x265   : > { %v909_v32 = vmax.f32 %v775_v31, 0.0  ;;  %v1727_v33 = vpop.f32.mrb[24].mxu1 }
 0x266   : > { %v790_v35 = vadd.f32 %v1727_v33, %v2597_v10  ;;  %v784_v36 = vpop.f32.mrb[25].mxu1 }
 0x267   : > { %v785_v38 = vadd.f32 %v2597_v10, %v784_v36  ;;  %1802 = vmatprep.mubr.f32.mxu0 %v909_v32 }
 0x268   : > { %1803 = vmatmul.mubr.f32.gmra.mrb[22].mxu0 %v910_v34  ;;  %v912_v43 = vmax.f32 %v790_v35, 0.0 }
 0x269   : > { %v911_v40 = vmax.f32 %v785_v38, 0.0  ;;  %v1730_v41 = vpop.f32.mrb[26].mxu1 }
 0x26a   : > { %v800_v44 = vadd.f32 %v1730_v41, %v2597_v10  ;;  %v794_v42 = vpop.f32.mrb[27].mxu1 }
 0x26b   : > { %v795_v45 = vadd.f32 %v2597_v10, %v794_v42  ;;  %1805 = vmatprep.mubr.f32.mxu0 %v911_v40 }
 0x26c   : > { %1806 = vmatmul.mubr.f32.gmra.mrb[24].mxu0 %v912_v43  ;;  %v914_v49 = vmax.f32 %v800_v44, 0.0 }
 0x26d   : > { %v913_v47 = vmax.f32 %v795_v45, 0.0  ;;  %v1733_v48 = vpop.f32.mrb[28].mxu1  ;;  %v1183_v45 = vlaneseq }
 0x26e   : > { %v810_v50 = vadd.f32 %v1733_v48, %v2597_v10  ;;  %v804_v51 = vpop.f32.mrb[29].mxu1  ;;  %v2634_v48 = vld [vmem:[%s2829_s6] ss:$0 sm:$0xff] }
 0x26f   : > { %v805_v39 = vadd.f32 %v2597_v10, %v804_v51  ;;  %1808 = vmatprep.mubr.f32.mxu0 %v913_v47  ;;  %v1184_v47 = vand.u32 127, %v1183_v45 }
 0x270   : > { %1809 = vmatmul.mubr.f32.gmra.mrb[26].mxu0 %v914_v49  ;;  %v916_v55 = vmax.f32 %v810_v50, 0.0 }
 0x271   : > { %v915_v52 = vmax.f32 %v805_v39, 0.0  ;;  %v1736_v53 = vpop.f32.mrb[30].mxu1  ;;  %vm1185_vm0 = vcmp.ge.s32.totalorder %v1184_v47, 8  ;;  %vm1186_vm1 = vcmp.lt.s32.totalorder %v1184_v47, 16 }
 0x272   : > { %v820_v56 = vadd.f32 %v1736_v53, %v2597_v10  ;;  %v814_v46 = vpop.f32.mrb[31].mxu1  ;;  %vm2638_vm2 = vmand %vm1185_vm0, %vm1186_vm1 }
 0x273   : > { %v815_v57 = vadd.f32 %v2597_v10, %v814_v46  ;;  %1811 = vmatprep.mubr.f32.mxu0 %v915_v52 }
 0x274   : > { %1812 = vmatmul.mubr.f32.gmra.mrb[28].mxu0 %v916_v55  ;;  %v918_v54 = vmax.f32 %v820_v56, 0.0 }
 0x275   : > { %v917_v58 = vmax.f32 %v815_v57, 0.0  ;;  %v1739_v59 = vpop.f32.mrb[32].mxu1 }
 0x276   : > { %v830_v60 = vadd.f32 %v1739_v59, %v2597_v10  ;;  %v824_v61 = vpop.f32.mrb[33].mxu1 }
 0x277   : > { %v825_v63 = vadd.f32 %v2597_v10, %v824_v61  ;;  %1814 = vmatprep.mubr.f32.mxu0 %v917_v58 }
 0x278   : > { %1815 = vmatmul.mubr.f32.gmra.mrb[30].mxu0 %v918_v54  ;;  %v920_v1 = vmax.f32 %v830_v60, 0.0 }
 0x279   : > { %v919_v62 = vmax.f32 %v825_v63, 0.0  ;;  %v1742_v0 = vpop.f32.mrb[34].mxu1 }
 0x27a   : > { %v840_v2 = vadd.f32 %v1742_v0, %v2597_v10  ;;  %v834_v3 = vpop.f32.mrb[35].mxu1 }
 0x27b   : > { %v835_v4 = vadd.f32 %v2597_v10, %v834_v3  ;;  %1817 = vmatprep.mubr.f32.mxu0 %v919_v62 }
 0x27c   : > { %1818 = vmatmul.mubr.f32.gmra.mrb[32].mxu0 %v920_v1  ;;  %v922_v7 = vmax.f32 %v840_v2, 0.0 }
 0x27d   : > { %v921_v5 = vmax.f32 %v835_v4, 0.0  ;;  %v1745_v6 = vpop.f32.mrb[36].mxu1 }
 0x27e   : > { %v850_v8 = vadd.f32 %v1745_v6, %v2597_v10  ;;  %v844_v9 = vpop.f32.mrb[37].mxu1 }
 0x27f   : > { %v845_v11 = vadd.f32 %v2597_v10, %v844_v9  ;;  %1820 = vmatprep.mubr.f32.mxu0 %v921_v5 }
 0x280   : > { %1821 = vmatmul.mubr.f32.gmra.mrb[34].mxu0 %v922_v7  ;;  %v924_v37 = vmax.f32 %v850_v8, 0.0 }
 0x281   : > { %v923_v12 = vmax.f32 %v845_v11, 0.0  ;;  %v1748_v13 = vpop.f32.mrb[38].mxu1 }
 0x282   : > { %v860_v14 = vadd.f32 %v1748_v13, %v2597_v10  ;;  %v854_v15 = vpop.f32.mrb[39].mxu1 }
 0x283   : > { %v855_v16 = vadd.f32 %v2597_v10, %v854_v15  ;;  %1823 = vmatprep.mubr.f32.mxu0 %v923_v12 }
 0x284   : > { %1824 = vmatmul.mubr.f32.gmra.mrb[36].mxu0 %v924_v37  ;;  %v926_v19 = vmax.f32 %v860_v14, 0.0 }
 0x285   : > { %v925_v17 = vmax.f32 %v855_v16, 0.0  ;;  %v1751_v18 = vpop.f32.mrb[40].mxu1 }
 0x286   : > { %v870_v20 = vadd.f32 %v1751_v18, %v2597_v10  ;;  %v864_v21 = vpop.f32.mrb[41].mxu1 }
 0x287   : > { %v865_v22 = vadd.f32 %v2597_v10, %v864_v21  ;;  %1826 = vmatprep.mubr.f32.mxu0 %v925_v17 }
 0x288   : > { %1827 = vmatmul.mubr.f32.gmra.mrb[38].mxu0 %v926_v19  ;;  %v928_v25 = vmax.f32 %v870_v20, 0.0 }
 0x289   : > { %v927_v23 = vmax.f32 %v865_v22, 0.0  ;;  %v1754_v24 = vpop.f32.mrb[42].mxu1 }
 0x28a   : > { %v880_v26 = vadd.f32 %v1754_v24, %v2597_v10  ;;  %v874_v27 = vpop.f32.mrb[43].mxu1 }
 0x28b   : > { %v875_v28 = vadd.f32 %v2597_v10, %v874_v27  ;;  %1829 = vmatprep.mubr.f32.mxu0 %v927_v23 }
 0x28c   : > { %1830 = vmatmul.mubr.f32.gmra.mrb[40].mxu0 %v928_v25  ;;  %v930_v31 = vmax.f32 %v880_v26, 0.0 }
 0x28d   : > { %v929_v29 = vmax.f32 %v875_v28, 0.0  ;;  %v1757_v30 = vpop.f32.mrb[44].mxu1 }
 0x28e   : > { %v890_v32 = vadd.f32 %v1757_v30, %v2597_v10  ;;  %v884_v33 = vpop.f32.mrb[45].mxu1 }
 0x28f   : > { %v885_v34 = vadd.f32 %v2597_v10, %v884_v33  ;;  %1832 = vmatprep.mubr.f32.mxu0 %v929_v29 }
 0x290   : > { %1833 = vmatmul.mubr.f32.gmra.mrb[42].mxu0 %v930_v31  ;;  %v932_v38 = vmax.f32 %v890_v32, 0.0 }
 0x291   : > { %v931_v35 = vmax.f32 %v885_v34, 0.0  ;;  %v1760_v36 = vpop.f32.mrb[46].mxu1 }
 0x292   : > { %v900_v40 = vadd.f32 %v1760_v36, %v2597_v10  ;;  %v894_v41 = vpop.f32.mrb[47].mxu1 }
 0x293   : > { %v895_v43 = vadd.f32 %v2597_v10, %v894_v41  ;;  %1835 = vmatprep.mubr.f32.mxu0 %v931_v35 }
 0x294   : > { %1836 = vmatmul.mubr.f32.gmra.mrb[44].mxu0 %v932_v38  ;;  %v934_v42 = vmax.f32 %v900_v40, 0.0 }
 0x295   : > { %v933_v44 = vmax.f32 %v895_v43, 0.0 }
 0x297   : > { %1838 = vmatprep.mubr.f32.mxu0 %v933_v44 }
 0x298   : > { %1839 = vmatmul.mubr.f32.gmra.mrb[46].mxu0 %v934_v42 }
 0x32f   : > { %v1795_v49 = vpop.f32.mrb[16].mxu0 }
 0x330   : > { %v1030_v50 = vadd.f32 %v1795_v49, %v2634_v48  ;;  %v1024_v10 = vpop.f32.mrb[17].mxu0 }
 0x331   : > { %v1025_v51 = vadd.f32 %v2634_v48, %v1024_v10 }
 0x332   : > { %v1189_v39 = vmax.f32 %v1030_v50, -20.0 }
 0x333   : > { %v1188_v53 = vmax.f32 %v1025_v51, -20.0  ;;  %v1798_v55 = vpop.f32.mrb[18].mxu0 }
 0x334   : > { %v1221_v56 = vmin.f32 %v1189_v39, 2.0  ;;  %v1040_v46 = vadd.f32 %v1798_v55, %v2634_v48  ;;  %v1034_v57 = vpop.f32.mrb[19].mxu0 }
 0x335   : > { %v1220_v58 = vmin.f32 %v1188_v53, 2.0  ;;  %v1035_v59 = vadd.f32 %v2634_v48, %v1034_v57 }
 0x336   : > { %v1253_v54 = vsel %vm2638_vm2, %v1221_v56, %v1030_v50  ;;  %v1191_v60 = vmax.f32 %v1040_v46, -20.0 }
 0x337   : > { %1285 = vst [vmem:[%s2648_s12 + $0x8] sm:$0xff] %v1253_v54  ;;  %v1252_v61 = vsel %vm2638_vm2, %v1220_v58, %v1025_v51  ;;  %v1190_v63 = vmax.f32 %v1035_v59, -20.0  ;;  %v1801_v62 = vpop.f32.mrb[20].mxu0 }
 0x338   : > { %1284 = vst [vmem:[%s2648_s12] sm:$0xff] %v1252_v61  ;;  %v1223_v0 = vmin.f32 %v1191_v60, 2.0  ;;  %v1050_v1 = vadd.f32 %v1801_v62, %v2634_v48  ;;  %v1044_v2 = vpop.f32.mrb[21].mxu0 }
 0x339   : > { %v1222_v3 = vmin.f32 %v1190_v63, 2.0  ;;  %v1045_v4 = vadd.f32 %v2634_v48, %v1044_v2 }
 0x33a   : > { %v1255_v5 = vsel %vm2638_vm2, %v1223_v0, %v1040_v46  ;;  %v1193_v6 = vmax.f32 %v1050_v1, -20.0 }
 0x33b   : > { %1287 = vst [vmem:[%s2648_s12 + $0x18] sm:$0xff] %v1255_v5  ;;  %v1254_v7 = vsel %vm2638_vm2, %v1222_v3, %v1035_v59  ;;  %v1192_v8 = vmax.f32 %v1045_v4, -20.0  ;;  %v1804_v9 = vpop.f32.mrb[22].mxu0 }
 0x33c   : > { %1286 = vst [vmem:[%s2648_s12 + $0x10] sm:$0xff] %v1254_v7  ;;  %v1225_v11 = vmin.f32 %v1193_v6, 2.0  ;;  %v1060_v12 = vadd.f32 %v1804_v9, %v2634_v48  ;;  %v1054_v13 = vpop.f32.mrb[23].mxu0 }
 0x33d   : > { %v1224_v37 = vmin.f32 %v1192_v8, 2.0  ;;  %v1055_v14 = vadd.f32 %v2634_v48, %v1054_v13 }
 0x33e   : > { %v1257_v15 = vsel %vm2638_vm2, %v1225_v11, %v1050_v1  ;;  %v1195_v16 = vmax.f32 %v1060_v12, -20.0 }
 0x33f   : > { %1289 = vst [vmem:[%s2648_s12 + $0x28] sm:$0xff] %v1257_v15  ;;  %v1256_v17 = vsel %vm2638_vm2, %v1224_v37, %v1045_v4  ;;  %v1194_v18 = vmax.f32 %v1055_v14, -20.0  ;;  %v1807_v19 = vpop.f32.mrb[24].mxu0 }
 0x340   : > { %1288 = vst [vmem:[%s2648_s12 + $0x20] sm:$0xff] %v1256_v17  ;;  %v1227_v20 = vmin.f32 %v1195_v16, 2.0  ;;  %v1070_v21 = vadd.f32 %v1807_v19, %v2634_v48  ;;  %v1064_v22 = vpop.f32.mrb[25].mxu0 }
 0x341   : > { %v1226_v23 = vmin.f32 %v1194_v18, 2.0  ;;  %v1065_v24 = vadd.f32 %v2634_v48, %v1064_v22 }
 0x342   : > { %v1259_v25 = vsel %vm2638_vm2, %v1227_v20, %v1060_v12  ;;  %v1197_v26 = vmax.f32 %v1070_v21, -20.0 }
 0x343   : > { %1291 = vst [vmem:[%s2648_s12 + $0x38] sm:$0xff] %v1259_v25  ;;  %v1258_v27 = vsel %vm2638_vm2, %v1226_v23, %v1055_v14  ;;  %v1196_v28 = vmax.f32 %v1065_v24, -20.0  ;;  %v1810_v29 = vpop.f32.mrb[26].mxu0 }
 0x344   : > { %1290 = vst [vmem:[%s2648_s12 + $0x30] sm:$0xff] %v1258_v27  ;;  %v1229_v30 = vmin.f32 %v1197_v26, 2.0  ;;  %v1080_v31 = vadd.f32 %v1810_v29, %v2634_v48  ;;  %v1074_v32 = vpop.f32.mrb[27].mxu0 }
 0x345   : > { %v1228_v33 = vmin.f32 %v1196_v28, 2.0  ;;  %v1075_v34 = vadd.f32 %v2634_v48, %v1074_v32 }
 0x346   : > { %v1261_v35 = vsel %vm2638_vm2, %v1229_v30, %v1070_v21  ;;  %v1199_v36 = vmax.f32 %v1080_v31, -20.0 }
 0x347   : > { %1293 = vst [vmem:[%s2648_s12 + $0x48] sm:$0xff] %v1261_v35  ;;  %v1260_v38 = vsel %vm2638_vm2, %v1228_v33, %v1065_v24  ;;  %v1198_v40 = vmax.f32 %v1075_v34, -20.0  ;;  %v1813_v41 = vpop.f32.mrb[28].mxu0 }
 0x348   : > { %1292 = vst [vmem:[%s2648_s12 + $0x40] sm:$0xff] %v1260_v38  ;;  %v1231_v43 = vmin.f32 %v1199_v36, 2.0  ;;  %v1090_v44 = vadd.f32 %v1813_v41, %v2634_v48  ;;  %v1084_v42 = vpop.f32.mrb[29].mxu0 }
 0x349   : > { %v1230_v45 = vmin.f32 %v1198_v40, 2.0  ;;  %v1085_v47 = vadd.f32 %v2634_v48, %v1084_v42 }
 0x34a   : > { %v1263_v49 = vsel %vm2638_vm2, %v1231_v43, %v1080_v31  ;;  %v1201_v50 = vmax.f32 %v1090_v44, -20.0 }
 0x34b   : > { %1295 = vst [vmem:[%s2648_s12 + $0x58] sm:$0xff] %v1263_v49  ;;  %v1262_v10 = vsel %vm2638_vm2, %v1230_v45, %v1075_v34  ;;  %v1200_v51 = vmax.f32 %v1085_v47, -20.0  ;;  %v1816_v39 = vpop.f32.mrb[30].mxu0 }
 0x34c   : > { %1294 = vst [vmem:[%s2648_s12 + $0x50] sm:$0xff] %v1262_v10  ;;  %v1233_v53 = vmin.f32 %v1201_v50, 2.0  ;;  %v1100_v55 = vadd.f32 %v1816_v39, %v2634_v48  ;;  %v1094_v56 = vpop.f32.mrb[31].mxu0 }
 0x34d   : > { %v1232_v46 = vmin.f32 %v1200_v51, 2.0  ;;  %v1095_v57 = vadd.f32 %v2634_v48, %v1094_v56 }
 0x34e   : > { %v1265_v58 = vsel %vm2638_vm2, %v1233_v53, %v1090_v44  ;;  %v1203_v59 = vmax.f32 %v1100_v55, -20.0 }
 0x34f   : > { %1297 = vst [vmem:[%s2648_s12 + $0x68] sm:$0xff] %v1265_v58  ;;  %v1264_v54 = vsel %vm2638_vm2, %v1232_v46, %v1085_v47  ;;  %v1202_v60 = vmax.f32 %v1095_v57, -20.0  ;;  %v1819_v61 = vpop.f32.mrb[32].mxu0 }
 0x350   : > { %1296 = vst [vmem:[%s2648_s12 + $0x60] sm:$0xff] %v1264_v54  ;;  %v1235_v63 = vmin.f32 %v1203_v59, 2.0  ;;  %v1110_v62 = vadd.f32 %v1819_v61, %v2634_v48  ;;  %v1104_v0 = vpop.f32.mrb[33].mxu0 }
 0x351   : > { %v1234_v1 = vmin.f32 %v1202_v60, 2.0  ;;  %v1105_v2 = vadd.f32 %v2634_v48, %v1104_v0 }
 0x352   : > { %v1267_v3 = vsel %vm2638_vm2, %v1235_v63, %v1100_v55  ;;  %v1205_v4 = vmax.f32 %v1110_v62, -20.0 }
 0x353   : > { %1299 = vst [vmem:[%s2648_s12 + $0x78] sm:$0xff] %v1267_v3  ;;  %v1266_v5 = vsel %vm2638_vm2, %v1234_v1, %v1095_v57  ;;  %v1204_v6 = vmax.f32 %v1105_v2, -20.0  ;;  %v1822_v7 = vpop.f32.mrb[34].mxu0 }
 0x354   : > { %1298 = vst [vmem:[%s2648_s12 + $0x70] sm:$0xff] %v1266_v5  ;;  %v1237_v8 = vmin.f32 %v1205_v4, 2.0  ;;  %v1120_v9 = vadd.f32 %v1822_v7, %v2634_v48  ;;  %v1114_v11 = vpop.f32.mrb[35].mxu0 }
 0x355   : > { %v1236_v12 = vmin.f32 %v1204_v6, 2.0  ;;  %v1115_v13 = vadd.f32 %v2634_v48, %v1114_v11 }
 0x356   : > { %v1269_v37 = vsel %vm2638_vm2, %v1237_v8, %v1110_v62  ;;  %v1207_v14 = vmax.f32 %v1120_v9, -20.0 }
 0x357   : > { %1301 = vst [vmem:[%s2648_s12 + $0x88] sm:$0xff] %v1269_v37  ;;  %v1268_v15 = vsel %vm2638_vm2, %v1236_v12, %v1105_v2  ;;  %v1206_v16 = vmax.f32 %v1115_v13, -20.0  ;;  %v1825_v17 = vpop.f32.mrb[36].mxu0 }
 0x358   : > { %1300 = vst [vmem:[%s2648_s12 + $0x80] sm:$0xff] %v1268_v15  ;;  %v1239_v18 = vmin.f32 %v1207_v14, 2.0  ;;  %v1130_v19 = vadd.f32 %v1825_v17, %v2634_v48  ;;  %v1124_v20 = vpop.f32.mrb[37].mxu0 }
 0x359   : > { %v1238_v21 = vmin.f32 %v1206_v16, 2.0  ;;  %v1125_v22 = vadd.f32 %v2634_v48, %v1124_v20 }
 0x35a   : > { %v1271_v23 = vsel %vm2638_vm2, %v1239_v18, %v1120_v9  ;;  %v1209_v24 = vmax.f32 %v1130_v19, -20.0 }
 0x35b   : > { %1303 = vst [vmem:[%s2648_s12 + $0x98] sm:$0xff] %v1271_v23  ;;  %v1270_v25 = vsel %vm2638_vm2, %v1238_v21, %v1115_v13  ;;  %v1208_v26 = vmax.f32 %v1125_v22, -20.0  ;;  %v1828_v27 = vpop.f32.mrb[38].mxu0 }
 0x35c   : > { %1302 = vst [vmem:[%s2648_s12 + $0x90] sm:$0xff] %v1270_v25  ;;  %v1241_v28 = vmin.f32 %v1209_v24, 2.0  ;;  %v1140_v29 = vadd.f32 %v1828_v27, %v2634_v48  ;;  %v1134_v30 = vpop.f32.mrb[39].mxu0 }
 0x35d   : > { %v1240_v31 = vmin.f32 %v1208_v26, 2.0  ;;  %v1135_v32 = vadd.f32 %v2634_v48, %v1134_v30 }
 0x35e   : > { %v1273_v33 = vsel %vm2638_vm2, %v1241_v28, %v1130_v19  ;;  %v1211_v34 = vmax.f32 %v1140_v29, -20.0 }
 0x35f   : > { %1305 = vst [vmem:[%s2648_s12 + $0xa8] sm:$0xff] %v1273_v33  ;;  %v1272_v35 = vsel %vm2638_vm2, %v1240_v31, %v1125_v22  ;;  %v1210_v36 = vmax.f32 %v1135_v32, -20.0  ;;  %v1831_v38 = vpop.f32.mrb[40].mxu0 }
 0x360   : > { %1304 = vst [vmem:[%s2648_s12 + $0xa0] sm:$0xff] %v1272_v35  ;;  %v1243_v40 = vmin.f32 %v1211_v34, 2.0  ;;  %v1150_v41 = vadd.f32 %v1831_v38, %v2634_v48  ;;  %v1144_v43 = vpop.f32.mrb[41].mxu0 }
 0x361   : > { %v1242_v44 = vmin.f32 %v1210_v36, 2.0  ;;  %v1145_v42 = vadd.f32 %v2634_v48, %v1144_v43 }
 0x362   : > { %v1275_v45 = vsel %vm2638_vm2, %v1243_v40, %v1140_v29  ;;  %v1213_v47 = vmax.f32 %v1150_v41, -20.0 }
 0x363   : > { %1307 = vst [vmem:[%s2648_s12 + $0xb8] sm:$0xff] %v1275_v45  ;;  %v1274_v49 = vsel %vm2638_vm2, %v1242_v44, %v1135_v32  ;;  %v1212_v50 = vmax.f32 %v1145_v42, -20.0  ;;  %v1834_v10 = vpop.f32.mrb[42].mxu0 }
 0x364   : > { %1306 = vst [vmem:[%s2648_s12 + $0xb0] sm:$0xff] %v1274_v49  ;;  %v1245_v51 = vmin.f32 %v1213_v47, 2.0  ;;  %v1160_v39 = vadd.f32 %v1834_v10, %v2634_v48  ;;  %v1154_v53 = vpop.f32.mrb[43].mxu0 }
 0x365   : > { %v1244_v55 = vmin.f32 %v1212_v50, 2.0  ;;  %v1155_v56 = vadd.f32 %v2634_v48, %v1154_v53 }
 0x366   : > { %v1277_v46 = vsel %vm2638_vm2, %v1245_v51, %v1150_v41  ;;  %v1215_v57 = vmax.f32 %v1160_v39, -20.0 }
 0x367   : > { %1309 = vst [vmem:[%s2648_s12 + $0xc8] sm:$0xff] %v1277_v46  ;;  %v1276_v58 = vsel %vm2638_vm2, %v1244_v55, %v1145_v42  ;;  %v1214_v59 = vmax.f32 %v1155_v56, -20.0  ;;  %v1837_v54 = vpop.f32.mrb[44].mxu0 }
 0x368   : > { %1308 = vst [vmem:[%s2648_s12 + $0xc0] sm:$0xff] %v1276_v58  ;;  %v1247_v60 = vmin.f32 %v1215_v57, 2.0  ;;  %v1170_v61 = vadd.f32 %v1837_v54, %v2634_v48  ;;  %v1164_v63 = vpop.f32.mrb[45].mxu0 }
 0x369   : > { %v1246_v62 = vmin.f32 %v1214_v59, 2.0  ;;  %v1165_v0 = vadd.f32 %v2634_v48, %v1164_v63 }
 0x36a   : > { %v1279_v1 = vsel %vm2638_vm2, %v1247_v60, %v1160_v39  ;;  %v1217_v2 = vmax.f32 %v1170_v61, -20.0 }
 0x36b   : > { %1311 = vst [vmem:[%s2648_s12 + $0xd8] sm:$0xff] %v1279_v1  ;;  %v1278_v3 = vsel %vm2638_vm2, %v1246_v62, %v1155_v56  ;;  %v1216_v4 = vmax.f32 %v1165_v0, -20.0  ;;  %v1840_v5 = vpop.f32.mrb[46].mxu0 }
 0x36c   : > { %1310 = vst [vmem:[%s2648_s12 + $0xd0] sm:$0xff] %v1278_v3  ;;  %v1249_v6 = vmin.f32 %v1217_v2, 2.0  ;;  %v1180_v7 = vadd.f32 %v1840_v5, %v2634_v48  ;;  %v1174_v8 = vpop.f32.mrb[47].mxu0 }
 0x36d   : > { %v1248_v9 = vmin.f32 %v1216_v4, 2.0  ;;  %v1175_v11 = vadd.f32 %v2634_v48, %v1174_v8 }
 0x36e   : > { %v1281_v12 = vsel %vm2638_vm2, %v1249_v6, %v1170_v61  ;;  %v1219_v13 = vmax.f32 %v1180_v7, -20.0 }
 0x36f   : > { %1313 = vst [vmem:[%s2648_s12 + $0xe8] sm:$0xff] %v1281_v12  ;;  %v1280_v37 = vsel %vm2638_vm2, %v1248_v9, %v1165_v0  ;;  %v1218_v14 = vmax.f32 %v1175_v11, -20.0 }
 0x370   : > { %1312 = vst [vmem:[%s2648_s12 + $0xe0] sm:$0xff] %v1280_v37  ;;  %v1251_v15 = vmin.f32 %v1219_v13, 2.0 }
 0x371   : > { %v1250_v16 = vmin.f32 %v1218_v14, 2.0 }
 0x372   : > { %v1283_v48 = vsel %vm2638_vm2, %v1251_v15, %v1180_v7 }
 0x373   : > { %1315 = vst [vmem:[%s2648_s12 + $0xf8] sm:$0xff] %v1283_v48  ;;  %v1282_v17 = vsel %vm2638_vm2, %v1250_v16, %v1175_v11 }
 0x374   : > { %1314 = vst [vmem:[%s2648_s12 + $0xf0] sm:$0xff] %v1282_v17 }
 0x375   : > { %2161 = shalt.err (!%p2158_p4)
}
 0x376   : > { %s2162_s13 = scalar_lea.hbm %s2771_s23, 4096  ;;  %s2166_s14 = scalar_lea.hbm %s2830_s7, 8192 }
 0x377   : > { %p2163_p9 = scmp.ne.s32.totalorder %s2771_s23, %s2162_s13  ;;  %p2167_p8 = scmp.lt.u32.totalorder %s2771_s23, %s2830_s7 }
 0x378   : > { %p2168_p13 = scmp.lt.u32.totalorder %s2166_s14, %s2162_s13  ;;  %p2170_p10 = scmp.lt.u32.totalorder %s2162_s13, %s2771_s23 }
 0x379   : > { %p2164_p0 = pnand %p2163_p9, %p2427_p5 }
 0x37a   : > { %p2169_p6 = por %p2168_p13, %p2167_p8 }
 0x37b   : > { %p2165_p11 = pneg %p2164_p0 }
 0x37c   : > { %p2171_p3 = por %p2170_p10, %p2169_p6 }
 0x37e   : > { %p2172_p7 = pnand %p2171_p3, %p2165_p11 }
 0x380   : > { %2175 = shalt.err (!%p2172_p7)
}
 0x381   : > { %s2231_s16 = smov 128   ;;  %s2232_s29 = smov 8  }
 0x382   : > { %1967 = dma.vmem_to_hbm [thread:$0]  (%p2427_p5), %s2773_s21, 4096, %s2771_s23, %s1317_s28, %s2231_s16, %s2231_s16, %s2232_s29  }
 0x383 PF: > { %s2852_s11 = sld [smem:[#allocation15_spill]]  ;;  %s1345_s8 = sand.u32 1, %s2210_s24  }
 0x384   : > { %p2854_p1 = scmp.ge.s32.totalorder %s2222_s27, 2  ;;  %s1346_s30 = scalar_lea.sflag [#allocation4], %s1345_s8 }
 0x389   : > { %p2853_p12 = scmp.ne.s32.totalorder %s2852_s11, 0 }
 0x38b   : > { %p1984_p2 = pnand %p2854_p1, %p2853_p12 }
 0x38d   : > { %2205 = dma.done.wait (!%p1984_p2), %s1346_s30, 4096  }
 0x38e   : > { %2207 = vsyncadd (!%p1984_p2), %s1346_s30, 4294963200  ;;  %p22_p4 = scmp.ge.s32.totalorder %s2413_s22, 4   ;;  %s2855_s24 = smov %s2214_s25 }
 0x38f   : > { %s2856_s25 = smov %s2218_s26  ;;  %s2857_s26 = smov %s2423_s18 }
 0x390   : > { %s2858_s27 = smov %s2413_s22  ;;  %24 = sbr.rel (!%p22_p4) target bundleno = 7 (0x7), region = 105 }
 0x397   :  { %1351 = vsyncpa [#allocation3], 1 }
 0x398   :  { %1353 = vsyncpa [#allocation3 + $0x1], 1 }
 0x399   :  { %1354 = vsyncpa [#allocation6], 1 }
 0x39a   :  { %1355 = vsyncpa [#allocation9], 1 }
 0x39b   :  { %1356 = vsyncpa [#allocation4], 1 }
 0x39c   :  { %1358 = vsyncpa [#allocation4 + $0x1], 1 }

</bundles_post_ra>
